<compile_context>
chip_gen: v6e
topology: v6e:2x2x1
jax: 0.10.0
libtpu: 0.0.40
codegen_flags: <defaults>
</compile_context>

<pallas_src>
import math

import numpy as np
import jax
import jax.numpy as jnp
from jax import lax
from jax.experimental import pallas as pl
from jax.experimental.pallas import tpu as pltpu

# ----- module hyper-parameters (deterministic, from __init__) -----
ME = 0.2
SE = 1e-7
M = math.cos(math.pi / 4 - ME)              # self.m
INV_COS_M = 1.0 / math.cos(M)
C_SE = math.log(1.0 - SE) - math.log(SE)    # log(1-se) - log(se)


def _softplus(x):
    # numerically stable softplus, matches nn.Softplus() (beta=1)
    return jnp.maximum(x, 0.0) + jnp.log1p(jnp.exp(-jnp.abs(x)))


def _logsumexp(v):
    m = jnp.max(v)
    return m + jnp.log(jnp.sum(jnp.exp(v - m)))


def pair_learning_kernel(
        ib_ref, jb_ref, valid_ref,          # scalar-prefetch (SMEM): (n_split, S) schedules
        xi_ref, xj_ref,                     # (TB, D) feature tiles (rows / cols of sim)
        labc_ref, labr_ref,                 # (nblk, TB, 1), (nblk, 1, TB) resident labels
        gam_ref,                            # (2,) f32 SMEM: gamma_p, gamma_n
        out_ref,                            # (1, 4, 8, 128) f32 per-group partials
        sum_n_acc, sum_p_acc,               # (TB, TB) f32 running sum-exp accumulators
        min_sp_acc, max_sn_acc):            # (TB, TB) f32 running min / max accumulators
    c = pl.program_id(0)                    # schedule group (sharded across TCs on v7x)
    s = pl.program_id(1)                    # step within the group (reduction axis)
    tb = xi_ref.shape[0]

    @pl.when(s == 0)
    def _init():
        sum_n_acc[...] = jnp.zeros_like(sum_n_acc)
        sum_p_acc[...] = jnp.zeros_like(sum_p_acc)
        min_sp_acc[...] = jnp.full_like(min_sp_acc, jnp.inf)
        max_sn_acc[...] = jnp.full_like(max_sn_acc, -jnp.inf)

    gamma_p = gam_ref[0]
    gamma_n = gam_ref[1]
    ib = ib_ref[c, s]
    jb = jb_ref[c, s]
    valid = valid_ref[c, s] > 0             # padded steps contribute nothing

    # (TB, TB) block of the similarity matrix on the MXU (f32 accumulation).
    # TODO(synk): if a v6e bundle dump shows a per-step vxpose for the rhs operand,
    # feed a pre-transposed (D, B) copy of x for xj and contract ((1,), (0,)).
    sim = lax.dot_general(xi_ref[...], xj_ref[...],
                          (((1,), (1,)), ((), ())),
                          preferred_element_type=jnp.float32)

    # Resident label blocks, selected by dynamic first-axis index (no per-step DMA).
    lab_i = labc_ref[ib]                    # (TB, 1)
    lab_j = labr_ref[jb]                    # (1, TB)
    label_eq = lab_i == lab_j               # (TB, TB)

    # Pair validity: off-diagonal blocks of the schedule (jb > ib) take every entry,
    # diagonal blocks keep only the local strictly-upper triangle, padded steps keep
    # nothing.  Local iota compare only -- no global-coordinate adds.
    local_triu = (lax.broadcasted_iota(jnp.int32, (tb, tb), 1) >
                  lax.broadcasted_iota(jnp.int32, (tb, tb), 0))
    take_all = jnp.logical_and(valid, jb > ib)        # scalar
    on_diag = jnp.logical_and(valid, jb == ib)        # scalar
    pair_ok = jnp.logical_or(take_all, jnp.logical_and(on_diag, local_triu))

    pos_mask = jnp.logical_and(label_eq, pair_ok)     # "sp" entries
    neg_mask = jnp.logical_xor(pair_ok, pos_mask)     # "sn" entries (pos_mask subset of pair_ok)

    # One fused exponential: positives get exp(-gamma_n*(sim+1)), negatives get
    # exp(gamma_p*(sim-1)).  Both exponents are <= 0 because inputs are L2-normalized
    # (sim in [-1, 1]); the global spmin / snmax shifts are applied analytically in
    # the JAX epilogue, so no second sweep over sim is needed.
    coef = jnp.where(label_eq, -gamma_n, gamma_p)
    offs = jnp.where(label_eq, -gamma_n, -gamma_p)
    expv = jnp.exp(coef * sim + offs)

    # TODO(synk): if a v5e bundle dump shows the single vst slot saturating, fold the
    # min/max (and optionally the sums) through a per-step lane reduction on the XLU
    # into (TB, 128) accumulators instead of four full (TB, TB) read-modify-writes.
    sum_p_acc[...] += jnp.where(pos_mask, expv, 0.0)
    sum_n_acc[...] += jnp.where(neg_mask, expv, 0.0)
    min_sp_acc[...] = jnp.minimum(min_sp_acc[...], jnp.where(pos_mask, sim, jnp.inf))
    max_sn_acc[...] = jnp.maximum(max_sn_acc[...], jnp.where(neg_mask, sim, -jnp.inf))

    @pl.when(s == pl.num_programs(1) - 1)
    def _finalize():
        # One cross-lane reduction per accumulator, once per schedule group; partials
        # are written as full lane-dense (8, 128) tiles (no masked stores).
        out_ref[0, 0] = jnp.broadcast_to(jnp.sum(sum_n_acc[...]), (8, 128))
        out_ref[0, 1] = jnp.broadcast_to(jnp.sum(sum_p_acc[...]), (8, 128))
        out_ref[0, 2] = jnp.broadcast_to(jnp.min(min_sp_acc[...]), (8, 128))
        out_ref[0, 3] = jnp.broadcast_to(jnp.max(max_sn_acc[...]), (8, 128))


def pair_learning(norm_x, proxy_sp, label, *, block_b=None, compute_dtype=None,
                  n_split=2):
    """norm_x: (B, D) L2-normalized features, proxy_sp: (P,) similarities, label: (B,)."""
    B, D = norm_x.shape
    P = proxy_sp.shape[0]

    # Tile size along the batch axis: the largest of {512, 256, 128} dividing B that
    # still leaves >= 4 blocks (amortizes the ~0.35 us/step grid overhead while
    # keeping a schedule worth splitting across cores); otherwise the largest divisor,
    # otherwise the whole batch.
    if block_b is None:
        block_b = B
        for cand in (512, 256, 128):
            if B % cand == 0:
                block_b = cand
                if B // cand >= 4:
                    break
    if B % block_b != 0:
        block_b = B
    nblk = B // block_b

    # Small-D regime is elementwise-bound: bf16 on the MXU buys nothing there while
    # the gamma (~20-40x) factors amplify its similarity rounding; default to f32.
    if compute_dtype is None:
        compute_dtype = jnp.float32 if D <= 256 else jnp.bfloat16

    # ---- upper-triangular block-pair schedule (the lower-triangle half of the
    # similarity matrix is never computed / DMA'd), split round-robin into n_split
    # groups forming a leading "parallel" grid axis (both v7x TensorCores).  Groups
    # are padded to a common length S by repeating their last pair with valid = 0.
    ib_np, jb_np = np.triu_indices(nblk)
    nsteps = int(ib_np.shape[0])
    n_split = max(1, min(int(n_split), nsteps))
    S = -(-nsteps // n_split)
    ib_sched = np.zeros((n_split, S), dtype=np.int32)
    jb_sched = np.zeros((n_split, S), dtype=np.int32)
    valid_sched = np.zeros((n_split, S), dtype=np.int32)
    for g in range(n_split):
        idx = np.arange(g, nsteps, n_split)
        k = idx.shape[0]
        ib_sched[g, :k] = ib_np[idx]
        jb_sched[g, :k] = jb_np[idx]
        valid_sched[g, :k] = 1
        if 0 < k < S:  # pad by repeating the last real pair (revisit -> no extra DMA)
            ib_sched[g, k:] = ib_np[idx[-1]]
            jb_sched[g, k:] = jb_np[idx[-1]]
    ib_sched = jnp.asarray(ib_sched)
    jb_sched = jnp.asarray(jb_sched)
    valid_sched = jnp.asarray(valid_sched)

    lab = label.astype(jnp.int32)
    labc_blocks = lab.reshape(nblk, block_b, 1)      # resident column labels
    labr_blocks = lab.reshape(nblk, 1, block_b)      # resident row labels
    proxy = proxy_sp.astype(jnp.float32)
    x = norm_x.astype(compute_dtype)                 # single cast; MXU accumulates f32

    # gamma_p / gamma_n depend only on (exact, integer) label-pair counts -> hoisted.
    # NOTE: like the PyTorch reference, a batch with <= 1 positive or <= 1 negative
    # pair yields log(<=0) = -inf/NaN (unguarded by design).
    n_same = (jnp.sum((lab[:, None] == lab[None, :]).astype(jnp.int32)) - B) // 2
    count_sp = n_same.astype(jnp.float32)
    count_sn = jnp.float32(B * (B - 1) // 2) - count_sp
    gamma_p = INV_COS_M * (jnp.log(count_sn - 1.0) + C_SE)
    gamma_n = jnp.log(count_sp - 1.0) + C_SE
    gamma_nw = INV_COS_M * (math.log(P - 1) + C_SE)          # python float, epilogue only
    gammas = jnp.stack([gamma_p, gamma_n]).astype(jnp.float32)

    total_steps = n_split * S
    itemsize = jnp.dtype(compute_dtype).itemsize
    cost = pl.CostEstimate(
        flops=2 * total_steps * block_b * block_b * D
              + 14 * total_steps * block_b * block_b,
        transcendentals=total_steps * block_b * block_b,
        bytes_accessed=total_steps * 2 * block_b * D * itemsize
                       + 8 * B + 8 * total_steps + n_split * 4 * 8 * 128 * 4,
    )

    # 4 f32 accumulators dominate VMEM; only block_b >= 1024 needs a raised scoped
    # limit (do not push to 1024 on v7x: 64 MiB physical VMEM).
    vmem_limit = 96 * 1024 * 1024 if block_b >= 1024 else None

    grid_spec = pltpu.PrefetchScalarGridSpec(
        num_scalar_prefetch=3,                       # ib, jb, valid schedules
        grid=(n_split, S),
        in_specs=[
            pl.BlockSpec((block_b, D), lambda c, s, ibr, jbr, vld: (ibr[c, s], 0)),   # x rows
            pl.BlockSpec((block_b, D), lambda c, s, ibr, jbr, vld: (jbr[c, s], 0)),   # x cols
            pl.BlockSpec((nblk, block_b, 1), lambda c, s, ibr, jbr, vld: (0, 0, 0)),  # labels col
            pl.BlockSpec((nblk, 1, block_b), lambda c, s, ibr, jbr, vld: (0, 0, 0)),  # labels row
            pl.BlockSpec(memory_space=pltpu.MemorySpace.SMEM),                        # gammas
        ],
        out_specs=pl.BlockSpec((1, 4, 8, 128),
                               lambda c, s, ibr, jbr, vld: (c, 0, 0, 0)),
        scratch_shapes=[pltpu.VMEM((block_b, block_b), jnp.float32)] * 4,
    )

    parts = pl.pallas_call(
        pair_learning_kernel,
        out_shape=jax.ShapeDtypeStruct((n_split, 4, 8, 128), jnp.float32),
        grid_spec=grid_spec,
        compiler_params=pltpu.CompilerParams(
            dimension_semantics=("parallel", "arbitrary"),
            vmem_limit_bytes=vmem_limit),
        cost_estimate=cost,
    )(ib_sched, jb_sched, valid_sched, x, x, labc_blocks, labr_blocks, gammas)

    # ---- tiny JAX epilogue: combine per-group partials and finish the circle loss.
    s_n = jnp.sum(parts[:, 0, 0, 0])                          # sum over negative pairs
    s_p = jnp.sum(parts[:, 1, 0, 0])                          # sum over positive pairs
    spmin = jnp.minimum(jnp.min(parts[:, 2, 0, 0]), jnp.min(proxy))
    snmax = jnp.max(parts[:, 3, 0, 0])

    # loss_sp = softplus( logsumexp_{sn} gamma_p * (sn - spmin) )
    loss_sp = _softplus(gamma_p * (1.0 - spmin) + jnp.log(s_n))
    # loss_sn = softplus( logsumexp over [proxy_sp ; sp] of gamma_* * (snmax - .) )
    term_sp = gamma_n * (snmax + 1.0) + jnp.log(s_p)
    z = jnp.concatenate([gamma_nw * (snmax - proxy), jnp.reshape(term_sp, (1,))])
    loss_sn = _softplus(_logsumexp(z))
    return loss_sp + loss_sn


# ------------------------- numpy reference (mirrors the torch code) -------------------------
def ref_pair_learning(norm_x, proxy_sp, label):
    x = np.asarray(norm_x, dtype=np.float64)
    proxy = np.asarray(proxy_sp, dtype=np.float64)
    lab = np.asarray(label)
    sim = x @ x.T
    lm = lab[:, None] == lab[None, :]
    triu = np.triu(np.ones_like(lm, dtype=bool), k=1)
    sp = sim[lm & triu]
    sn = sim[(~lm) & triu]
    total_sp = np.concatenate([proxy, sp])
    spmin = total_sp.min()
    snmax = sn.max()
    gamma_p = INV_COS_M * (math.log(len(sn) - 1) + C_SE)
    gamma_n = math.log(len(sp) - 1) + C_SE
    gamma_nw = INV_COS_M * (math.log(len(proxy) - 1) + C_SE)
    gamma_nt = np.concatenate([gamma_nw * np.ones_like(proxy),
                               gamma_n * np.ones_like(sp)])

    def lse(v):
        m = v.max()
        return m + np.log(np.exp(v - m).sum())

    def softplus(v):
        return np.log1p(np.exp(-abs(v))) + max(v, 0.0)

    loss_sp = softplus(lse(gamma_p * (sn - spmin)))
    loss_sn = softplus(lse(gamma_nt * (snmax - total_sp)))
    return loss_sp + loss_sn


if __name__ == "__main__":
    key = jax.random.PRNGKey(0)
    B, D, P = 256, 64, 8       # small, but big enough for a 2x2 block tiling

    k1, k2, k3 = jax.random.split(key, 3)
    feats = jax.random.normal(k1, (B, D), dtype=jnp.float32)
    norm_x = feats / jnp.linalg.norm(feats, axis=-1, keepdims=True)
    # 16 identity classes x 16 samples, shuffled -> positive and negative pairs spread
    # across every block of the similarity matrix.
    label = jax.random.permutation(
        k3, jnp.repeat(jnp.arange(16, dtype=jnp.int32), B // 16))
    # proxy cosine similarities in (0.3, 0.9)
    proxy_sp = 0.3 + 0.6 * jax.random.uniform(k2, (P,), dtype=jnp.float32)

    ref = ref_pair_learning(np.asarray(norm_x), np.asarray(proxy_sp), np.asarray(label))

    # Default path (f32 at small D, block_b=128 -> 2x2 block tiling, 2-way padded split).
    loss_def = jax.block_until_ready(pair_learning(norm_x, proxy_sp, label))
    np.testing.assert_allclose(float(loss_def), float(ref), rtol=5e-4, atol=5e-4)

    # Single-block path (block_b = B) exercising the degenerate 1-step / 1-split case.
    loss_one = jax.block_until_ready(
        pair_learning(norm_x, proxy_sp, label, block_b=256, compute_dtype=jnp.float32))
    np.testing.assert_allclose(float(loss_one), float(ref), rtol=5e-4, atol=5e-4)

    # bf16 MXU path (the large-D default): looser tolerance for the ~1e-3 similarity
    # rounding amplified by the gamma_* scale factors.
    loss_bf16 = jax.block_until_ready(
        pair_learning(norm_x, proxy_sp, label, block_b=128, compute_dtype=jnp.bfloat16))
    np.testing.assert_allclose(float(loss_bf16), float(ref), rtol=5e-2, atol=5e-2)

    print("KERNEL_OK")
</pallas_src>

<mosaic_0001>
module attributes {stable_mosaic.version = 11 : i64} {
  func.func @pair_learning_kernel(%arg0: i32, %arg1: i32, %arg2: memref<2x2xi32, #tpu.memory_space<smem>>, %arg3: memref<2x2xi32, #tpu.memory_space<smem>>, %arg4: memref<2x2xi32, #tpu.memory_space<smem>>, %arg5: memref<128x64xf32, #tpu.memory_space<vmem>>, %arg6: memref<128x64xf32, #tpu.memory_space<vmem>>, %arg7: memref<2x128x1xi32, #tpu.memory_space<vmem>>, %arg8: memref<2x1x128xi32, #tpu.memory_space<vmem>>, %arg9: memref<2xf32, #tpu.memory_space<smem>>, %arg10: memref<1x4x8x128xf32, #tpu.memory_space<vmem>>, %arg11: memref<128x128xf32, #tpu.memory_space<vmem>>, %arg12: memref<128x128xf32, #tpu.memory_space<vmem>>, %arg13: memref<128x128xf32, #tpu.memory_space<vmem>>, %arg14: memref<128x128xf32, #tpu.memory_space<vmem>>) attributes {dimension_semantics = [#tpu.dimension_semantics<parallel>, #tpu.dimension_semantics<arbitrary>], iteration_bounds = array<i64: 2, 2>, scalar_prefetch = 3 : i64, scratch_operands = 4 : i64, tpu.core_type = #tpu.core_type<tc>, window_params = [{transform_indices = @transform_0, window_bounds = array<i64: 128, 64>}, {transform_indices = @transform_1, window_bounds = array<i64: 128, 64>}, {pipeline_mode = #tpu.pipeline_mode<synchronous>, transform_indices = @transform_2, window_bounds = array<i64: 2, 128, 1>}, {pipeline_mode = #tpu.pipeline_mode<synchronous>, transform_indices = @transform_3, window_bounds = array<i64: 2, 1, 128>}, {transform_indices = @transform_4, window_bounds = array<i64: 2>}, {transform_indices = @transform_5, window_bounds = array<i64: 1, 4, 8, 128>}]} {
    %c0_i32 = arith.constant 0 : i32
    %0 = arith.cmpi eq, %arg1, %c0_i32 : i32
    %1 = arith.extui %0 : i1 to i32
    %c0_i32_0 = arith.constant 0 : i32
    %2 = arith.cmpi ne, %1, %c0_i32_0 : i32
    scf.if %2 {
      %cst_34 = arith.constant 0.000000e+00 : f32
      %75 = vector.broadcast %cst_34 : f32 to vector<128x128xf32>
      %c0_35 = arith.constant 0 : index
      %c0_36 = arith.constant 0 : index
      %76 = vector.load %arg11[%c0_35, %c0_36] : memref<128x128xf32, #tpu.memory_space<vmem>>, vector<128x128xf32>
      tpu.vector_store %arg11[%c0_35, %c0_36], %75 {strides = array<i32>} : memref<128x128xf32, #tpu.memory_space<vmem>>, vector<128x128xf32>,
      %cst_37 = arith.constant 0.000000e+00 : f32
      %77 = vector.broadcast %cst_37 : f32 to vector<128x128xf32>
      %c0_38 = arith.constant 0 : index
      %c0_39 = arith.constant 0 : index
      %78 = vector.load %arg12[%c0_38, %c0_39] : memref<128x128xf32, #tpu.memory_space<vmem>>, vector<128x128xf32>
      tpu.vector_store %arg12[%c0_38, %c0_39], %77 {strides = array<i32>} : memref<128x128xf32, #tpu.memory_space<vmem>>, vector<128x128xf32>,
      %cst_40 = arith.constant 0x7F800000 : f32
      %79 = vector.broadcast %cst_40 : f32 to vector<128x128xf32>
      %c0_41 = arith.constant 0 : index
      %c0_42 = arith.constant 0 : index
      %80 = vector.load %arg13[%c0_41, %c0_42] : memref<128x128xf32, #tpu.memory_space<vmem>>, vector<128x128xf32>
      tpu.vector_store %arg13[%c0_41, %c0_42], %79 {strides = array<i32>} : memref<128x128xf32, #tpu.memory_space<vmem>>, vector<128x128xf32>,
      %cst_43 = arith.constant 0xFF800000 : f32
      %81 = vector.broadcast %cst_43 : f32 to vector<128x128xf32>
      %c0_44 = arith.constant 0 : index
      %c0_45 = arith.constant 0 : index
      %82 = vector.load %arg14[%c0_44, %c0_45] : memref<128x128xf32, #tpu.memory_space<vmem>>, vector<128x128xf32>
      tpu.vector_store %arg14[%c0_44, %c0_45], %81 {strides = array<i32>} : memref<128x128xf32, #tpu.memory_space<vmem>>, vector<128x128xf32>,
    } else {
    }
    %c0 = arith.constant 0 : index
    %3 = memref.load %arg9[%c0] : memref<2xf32, #tpu.memory_space<smem>>
    %c1 = arith.constant 1 : index
    %4 = memref.load %arg9[%c1] : memref<2xf32, #tpu.memory_space<smem>>
    %5 = arith.index_cast %arg0 : i32 to index
    %6 = arith.index_cast %arg1 : i32 to index
    %7 = memref.load %arg2[%5, %6] : memref<2x2xi32, #tpu.memory_space<smem>>
    %8 = arith.index_cast %arg0 : i32 to index
    %9 = arith.index_cast %arg1 : i32 to index
    %10 = memref.load %arg3[%8, %9] : memref<2x2xi32, #tpu.memory_space<smem>>
    %11 = arith.index_cast %arg0 : i32 to index
    %12 = arith.index_cast %arg1 : i32 to index
    %13 = memref.load %arg4[%11, %12] : memref<2x2xi32, #tpu.memory_space<smem>>
    %c0_i32_1 = arith.constant 0 : i32
    %14 = arith.cmpi sgt, %13, %c0_i32_1 : i32
    %c0_2 = arith.constant 0 : index
    %c0_3 = arith.constant 0 : index
    %15 = vector.load %arg5[%c0_2, %c0_3] : memref<128x64xf32, #tpu.memory_space<vmem>>, vector<128x64xf32>
    %c0_4 = arith.constant 0 : index
    %c0_5 = arith.constant 0 : index
    %16 = vector.load %arg6[%c0_4, %c0_5] : memref<128x64xf32, #tpu.memory_space<vmem>>, vector<128x64xf32>
    %cst = arith.constant dense<0.000000e+00> : vector<128x128xf32>
    %17 = tpu.matmul %15, %16, %cst {dimension_numbers = #tpu.dot_dimension_numbers<[1], [1], [0], [0], [0, 0, 1, 0], [], []>} : vector<128x64xf32>, vector<128x64xf32>, vector<128x128xf32> -> vector<128x128xf32>
    %18 = arith.index_cast %7 : i32 to index
    %c0_6 = arith.constant 0 : index
    %c0_7 = arith.constant 0 : index
    %19 = vector.load %arg7[%18, %c0_6, %c0_7] : memref<2x128x1xi32, #tpu.memory_space<vmem>>, vector<1x128x1xi32>
    %20 = vector.shape_cast %19 : vector<1x128x1xi32> to vector<128x1xi32>
    %21 = arith.index_cast %10 : i32 to index
    %c0_8 = arith.constant 0 : index
    %c0_9 = arith.constant 0 : index
    %22 = vector.load %arg8[%21, %c0_8, %c0_9] : memref<2x1x128xi32, #tpu.memory_space<vmem>>, vector<1x1x128xi32>
    %23 = vector.shape_cast %22 : vector<1x1x128xi32> to vector<1x128xi32>
    %24 = vector.broadcast %20 : vector<128x1xi32> to vector<128x128xi32>
    %25 = vector.broadcast %23 : vector<1x128xi32> to vector<128x128xi32>
    %26 = arith.cmpi eq, %24, %25 : vector<128x128xi32>
    %27 = tpu.iota {dimensions = array<i32: 1>} : vector<128x128xi32>
    %28 = tpu.iota {dimensions = array<i32: 0>} : vector<128x128xi32>
    %29 = arith.cmpi sgt, %27, %28 : vector<128x128xi32>
    %30 = arith.cmpi sgt, %10, %7 : i32
    %31 = arith.andi %14, %30 : i1
    %32 = arith.cmpi eq, %10, %7 : i32
    %33 = arith.andi %14, %32 : i1
    %34 = vector.broadcast %33 : i1 to vector<128x128xi1>
    %35 = arith.andi %34, %29 : vector<128x128xi1>
    %36 = vector.broadcast %31 : i1 to vector<128x128xi1>
    %37 = arith.ori %36, %35 : vector<128x128xi1>
    %38 = arith.andi %26, %37 : vector<128x128xi1>
    %39 = arith.xori %37, %38 : vector<128x128xi1>
    %cst_10 = arith.constant 0.000000e+00 : f32
    %40 = arith.subf %cst_10, %4 : f32
    %41 = vector.broadcast %40 : f32 to vector<128x128xf32>
    %42 = vector.broadcast %3 : f32 to vector<128x128xf32>
    %43 = arith.select %26, %41, %42 : vector<128x128xi1>, vector<128x128xf32>
    %cst_11 = arith.constant 0.000000e+00 : f32
    %44 = arith.subf %cst_11, %4 : f32
    %cst_12 = arith.constant 0.000000e+00 : f32
    %45 = arith.subf %cst_12, %3 : f32
    %46 = vector.broadcast %44 : f32 to vector<128x128xf32>
    %47 = vector.broadcast %45 : f32 to vector<128x128xf32>
    %48 = arith.select %26, %46, %47 : vector<128x128xi1>, vector<128x128xf32>
    %49 = arith.mulf %43, %17 : vector<128x128xf32>
    %50 = arith.addf %49, %48 : vector<128x128xf32>
    %51 = math.exp %50 : vector<128x128xf32>
    %c0_13 = arith.constant 0 : index
    %c0_14 = arith.constant 0 : index
    %52 = vector.load %arg12[%c0_13, %c0_14] : memref<128x128xf32, #tpu.memory_space<vmem>>, vector<128x128xf32>
    %cst_15 = arith.constant 0.000000e+00 : f32
    %53 = vector.broadcast %cst_15 : f32 to vector<128x128xf32>
    %54 = arith.select %38, %51, %53 : vector<128x128xi1>, vector<128x128xf32>
    %55 = arith.addf %52, %54 : vector<128x128xf32>
    %c0_16 = arith.constant 0 : index
    %c0_17 = arith.constant 0 : index
    %56 = vector.load %arg12[%c0_16, %c0_17] : memref<128x128xf32, #tpu.memory_space<vmem>>, vector<128x128xf32>
    tpu.vector_store %arg12[%c0_16, %c0_17], %55 {strides = array<i32>} : memref<128x128xf32, #tpu.memory_space<vmem>>, vector<128x128xf32>,
    %c0_18 = arith.constant 0 : index
    %c0_19 = arith.constant 0 : index
    %57 = vector.load %arg11[%c0_18, %c0_19] : memref<128x128xf32, #tpu.memory_space<vmem>>, vector<128x128xf32>
    %cst_20 = arith.constant 0.000000e+00 : f32
    %58 = vector.broadcast %cst_20 : f32 to vector<128x128xf32>
    %59 = arith.select %39, %51, %58 : vector<128x128xi1>, vector<128x128xf32>
    %60 = arith.addf %57, %59 : vector<128x128xf32>
    %c0_21 = arith.constant 0 : index
    %c0_22 = arith.constant 0 : index
    %61 = vector.load %arg11[%c0_21, %c0_22] : memref<128x128xf32, #tpu.memory_space<vmem>>, vector<128x128xf32>
    tpu.vector_store %arg11[%c0_21, %c0_22], %60 {strides = array<i32>} : memref<128x128xf32, #tpu.memory_space<vmem>>, vector<128x128xf32>,
    %c0_23 = arith.constant 0 : index
    %c0_24 = arith.constant 0 : index
    %62 = vector.load %arg13[%c0_23, %c0_24] : memref<128x128xf32, #tpu.memory_space<vmem>>, vector<128x128xf32>
    %cst_25 = arith.constant 0x7F800000 : f32
    %63 = vector.broadcast %cst_25 : f32 to vector<128x128xf32>
    %64 = arith.select %38, %17, %63 : vector<128x128xi1>, vector<128x128xf32>
    %65 = arith.minimumf %62, %64 : vector<128x128xf32>
    %c0_26 = arith.constant 0 : index
    %c0_27 = arith.constant 0 : index
    %66 = vector.load %arg13[%c0_26, %c0_27] : memref<128x128xf32, #tpu.memory_space<vmem>>, vector<128x128xf32>
    tpu.vector_store %arg13[%c0_26, %c0_27], %65 {strides = array<i32>} : memref<128x128xf32, #tpu.memory_space<vmem>>, vector<128x128xf32>,
    %c0_28 = arith.constant 0 : index
    %c0_29 = arith.constant 0 : index
    %67 = vector.load %arg14[%c0_28, %c0_29] : memref<128x128xf32, #tpu.memory_space<vmem>>, vector<128x128xf32>
    %cst_30 = arith.constant 0xFF800000 : f32
    %68 = vector.broadcast %cst_30 : f32 to vector<128x128xf32>
    %69 = arith.select %39, %17, %68 : vector<128x128xi1>, vector<128x128xf32>
    %70 = arith.maximumf %67, %69 : vector<128x128xf32>
    %c0_31 = arith.constant 0 : index
    %c0_32 = arith.constant 0 : index
    %71 = vector.load %arg14[%c0_31, %c0_32] : memref<128x128xf32, #tpu.memory_space<vmem>>, vector<128x128xf32>
    tpu.vector_store %arg14[%c0_31, %c0_32], %70 {strides = array<i32>} : memref<128x128xf32, #tpu.memory_space<vmem>>, vector<128x128xf32>,
    %c1_i32 = arith.constant 1 : i32
    %72 = arith.cmpi eq, %arg1, %c1_i32 : i32
    %73 = arith.extui %72 : i1 to i32
    %c0_i32_33 = arith.constant 0 : i32
    %74 = arith.cmpi ne, %73, %c0_i32_33 : i32
    scf.if %74 {
      %c0_34 = arith.constant 0 : index
      %c0_35 = arith.constant 0 : index
      %75 = vector.load %arg11[%c0_34, %c0_35] : memref<128x128xf32, #tpu.memory_space<vmem>>, vector<128x128xf32>
      %76 = vector.shape_cast %75 : vector<128x128xf32> to vector<1x128x128xf32>
      %cst_36 = arith.constant dense<0.000000e+00> : vector<1xf32>
      %77 = vector.multi_reduction <add>, %76, %cst_36 [1, 2] : vector<1x128x128xf32> to vector<1xf32>
      %78 = vector.shape_cast %77 : vector<1xf32> to vector<1x1x1xf32>
      %79 = vector.extract %78[0, 0, 0] : f32 from vector<1x1x1xf32>
      %80 = vector.broadcast %79 : f32 to vector<8x128xf32>
      %c0_37 = arith.constant 0 : index
      %c0_38 = arith.constant 0 : index
      %c0_39 = arith.constant 0 : index
      %c0_40 = arith.constant 0 : index
      %81 = vector.load %arg10[%c0_37, %c0_38, %c0_39, %c0_40] : memref<1x4x8x128xf32, #tpu.memory_space<vmem>>, vector<1x1x8x128xf32>
      %82 = vector.shape_cast %81 : vector<1x1x8x128xf32> to vector<8x128xf32>
      %83 = vector.shape_cast %80 : vector<8x128xf32> to vector<1x1x8x128xf32>
      tpu.vector_store %arg10[%c0_37, %c0_38, %c0_39, %c0_40], %83 {strides = array<i32>} : memref<1x4x8x128xf32, #tpu.memory_space<vmem>>, vector<1x1x8x128xf32>,
      %c0_41 = arith.constant 0 : index
      %c0_42 = arith.constant 0 : index
      %84 = vector.load %arg12[%c0_41, %c0_42] : memref<128x128xf32, #tpu.memory_space<vmem>>, vector<128x128xf32>
      %85 = vector.shape_cast %84 : vector<128x128xf32> to vector<1x128x128xf32>
      %cst_43 = arith.constant dense<0.000000e+00> : vector<1xf32>
      %86 = vector.multi_reduction <add>, %85, %cst_43 [1, 2] : vector<1x128x128xf32> to vector<1xf32>
      %87 = vector.shape_cast %86 : vector<1xf32> to vector<1x1x1xf32>
      %88 = vector.extract %87[0, 0, 0] : f32 from vector<1x1x1xf32>
      %89 = vector.broadcast %88 : f32 to vector<8x128xf32>
      %c0_44 = arith.constant 0 : index
      %c1_45 = arith.constant 1 : index
      %c0_46 = arith.constant 0 : index
      %c0_47 = arith.constant 0 : index
      %90 = vector.load %arg10[%c0_44, %c1_45, %c0_46, %c0_47] : memref<1x4x8x128xf32, #tpu.memory_space<vmem>>, vector<1x1x8x128xf32>
      %91 = vector.shape_cast %90 : vector<1x1x8x128xf32> to vector<8x128xf32>
      %92 = vector.shape_cast %89 : vector<8x128xf32> to vector<1x1x8x128xf32>
      tpu.vector_store %arg10[%c0_44, %c1_45, %c0_46, %c0_47], %92 {strides = array<i32>} : memref<1x4x8x128xf32, #tpu.memory_space<vmem>>, vector<1x1x8x128xf32>,
      %c0_48 = arith.constant 0 : index
      %c0_49 = arith.constant 0 : index
      %93 = vector.load %arg13[%c0_48, %c0_49] : memref<128x128xf32, #tpu.memory_space<vmem>>, vector<128x128xf32>
      %94 = vector.shape_cast %93 : vector<128x128xf32> to vector<1x128x128xf32>
      %cst_50 = arith.constant dense<0x7F800000> : vector<1xf32>
      %95 = vector.multi_reduction <minimumf>, %94, %cst_50 [1, 2] : vector<1x128x128xf32> to vector<1xf32>
      %96 = vector.shape_cast %95 : vector<1xf32> to vector<1x1x1xf32>
      %97 = vector.extract %96[0, 0, 0] : f32 from vector<1x1x1xf32>
      %98 = vector.broadcast %97 : f32 to vector<8x128xf32>
      %c0_51 = arith.constant 0 : index
      %c2 = arith.constant 2 : index
      %c0_52 = arith.constant 0 : index
      %c0_53 = arith.constant 0 : index
      %99 = vector.load %arg10[%c0_51, %c2, %c0_52, %c0_53] : memref<1x4x8x128xf32, #tpu.memory_space<vmem>>, vector<1x1x8x128xf32>
      %100 = vector.shape_cast %99 : vector<1x1x8x128xf32> to vector<8x128xf32>
      %101 = vector.shape_cast %98 : vector<8x128xf32> to vector<1x1x8x128xf32>
      tpu.vector_store %arg10[%c0_51, %c2, %c0_52, %c0_53], %101 {strides = array<i32>} : memref<1x4x8x128xf32, #tpu.memory_space<vmem>>, vector<1x1x8x128xf32>,
      %c0_54 = arith.constant 0 : index
      %c0_55 = arith.constant 0 : index
      %102 = vector.load %arg14[%c0_54, %c0_55] : memref<128x128xf32, #tpu.memory_space<vmem>>, vector<128x128xf32>
      %103 = vector.shape_cast %102 : vector<128x128xf32> to vector<1x128x128xf32>
      %cst_56 = arith.constant dense<0xFF800000> : vector<1xf32>
      %104 = vector.multi_reduction <maximumf>, %103, %cst_56 [1, 2] : vector<1x128x128xf32> to vector<1xf32>
      %105 = vector.shape_cast %104 : vector<1xf32> to vector<1x1x1xf32>
      %106 = vector.extract %105[0, 0, 0] : f32 from vector<1x1x1xf32>
      %107 = vector.broadcast %106 : f32 to vector<8x128xf32>
      %c0_57 = arith.constant 0 : index
      %c3 = arith.constant 3 : index
      %c0_58 = arith.constant 0 : index
      %c0_59 = arith.constant 0 : index
      %108 = vector.load %arg10[%c0_57, %c3, %c0_58, %c0_59] : memref<1x4x8x128xf32, #tpu.memory_space<vmem>>, vector<1x1x8x128xf32>
      %109 = vector.shape_cast %108 : vector<1x1x8x128xf32> to vector<8x128xf32>
      %110 = vector.shape_cast %107 : vector<8x128xf32> to vector<1x1x8x128xf32>
      tpu.vector_store %arg10[%c0_57, %c3, %c0_58, %c0_59], %110 {strides = array<i32>} : memref<1x4x8x128xf32, #tpu.memory_space<vmem>>, vector<1x1x8x128xf32>,
    } else {
    }
    return
  }
  func.func @transform_0(%arg0: i32, %arg1: i32, %arg2: memref<2x2xi32, #tpu.memory_space<smem>>, %arg3: memref<2x2xi32, #tpu.memory_space<smem>>, %arg4: memref<2x2xi32, #tpu.memory_space<smem>>) -> (i32, i32) {
    %0 = arith.index_cast %arg0 : i32 to index
    %1 = arith.index_cast %arg1 : i32 to index
    %2 = memref.load %arg2[%0, %1] : memref<2x2xi32, #tpu.memory_space<smem>>
    %c0_i32 = arith.constant 0 : i32
    %c0_i32_0 = arith.constant 0 : i32
    return %2, %c0_i32 : i32, i32
  }
  func.func @transform_1(%arg0: i32, %arg1: i32, %arg2: memref<2x2xi32, #tpu.memory_space<smem>>, %arg3: memref<2x2xi32, #tpu.memory_space<smem>>, %arg4: memref<2x2xi32, #tpu.memory_space<smem>>) -> (i32, i32) {
    %0 = arith.index_cast %arg0 : i32 to index
    %1 = arith.index_cast %arg1 : i32 to index
    %2 = memref.load %arg3[%0, %1] : memref<2x2xi32, #tpu.memory_space<smem>>
    %c0_i32 = arith.constant 0 : i32
    %c0_i32_0 = arith.constant 0 : i32
    return %2, %c0_i32 : i32, i32
  }
  func.func @transform_2(%arg0: i32, %arg1: i32, %arg2: memref<2x2xi32, #tpu.memory_space<smem>>, %arg3: memref<2x2xi32, #tpu.memory_space<smem>>, %arg4: memref<2x2xi32, #tpu.memory_space<smem>>) -> (i32, i32, i32) {
    %c0_i32 = arith.constant 0 : i32
    %c0_i32_0 = arith.constant 0 : i32
    %c0_i32_1 = arith.constant 0 : i32
    %c0_i32_2 = arith.constant 0 : i32
    return %c0_i32, %c0_i32_0, %c0_i32_1 : i32, i32, i32
  }
  func.func @transform_3(%arg0: i32, %arg1: i32, %arg2: memref<2x2xi32, #tpu.memory_space<smem>>, %arg3: memref<2x2xi32, #tpu.memory_space<smem>>, %arg4: memref<2x2xi32, #tpu.memory_space<smem>>) -> (i32, i32, i32) {
    %c0_i32 = arith.constant 0 : i32
    %c0_i32_0 = arith.constant 0 : i32
    %c0_i32_1 = arith.constant 0 : i32
    %c0_i32_2 = arith.constant 0 : i32
    return %c0_i32, %c0_i32_0, %c0_i32_1 : i32, i32, i32
  }
  func.func @transform_4(%arg0: i32, %arg1: i32, %arg2: memref<2x2xi32, #tpu.memory_space<smem>>, %arg3: memref<2x2xi32, #tpu.memory_space<smem>>, %arg4: memref<2x2xi32, #tpu.memory_space<smem>>) -> i32 {
    %c0_i32 = arith.constant 0 : i32
    %c0_i32_0 = arith.constant 0 : i32
    return %c0_i32 : i32
  }
  func.func @transform_5(%arg0: i32, %arg1: i32, %arg2: memref<2x2xi32, #tpu.memory_space<smem>>, %arg3: memref<2x2xi32, #tpu.memory_space<smem>>, %arg4: memref<2x2xi32, #tpu.memory_space<smem>>) -> (i32, i32, i32, i32) {
    %c0_i32 = arith.constant 0 : i32
    %c0_i32_0 = arith.constant 0 : i32
    %c0_i32_1 = arith.constant 0 : i32
    %c0_i32_2 = arith.constant 0 : i32
    return %arg0, %c0_i32, %c0_i32_0, %c0_i32_1 : i32, i32, i32, i32
  }
}

</mosaic_0001>

<bundles_post_ra>
// kernel: tpu_custom_call.1
= control target key start
LH: loop header
LB: loop body
LE: loop exit
PB: predicated region body
PF: predicated region fallthrough
CT: control target
= control target key end

     0   :  { %s3533_s0 = inlined_call_operand.vmem [shape: s32[2,2], index: 0, kind: input, shape index: {}]   ;;  %s3534_s3 = inlined_call_operand.vmem [shape: f32[256,64], index: 3, kind: input, shape index: {}]   ;;  %s3535_s4 = inlined_call_operand.vmem [shape: f32[256,64], index: 4, kind: input, shape index: {}]   ;;  %s3536_s5 = inlined_call_operand.vmem [shape: s32[2,128,1], index: 5, kind: input, shape index: {}]   ;;  %s3537_s6 = inlined_call_operand.vmem [shape: s32[2,1,128], index: 6, kind: input, shape index: {}]   ;;  %s3538_s7 = inlined_call_operand.vmem [shape: f32[2], index: 7, kind: input, shape index: {}]   ;;  %s3539_s8 = inlined_call_operand.hbm [shape: f32[2,4,8,128], index: 8, kind: output, shape index: {}]   ;;  %s3540_s1 = inlined_call_operand.vmem [shape: s32[2,2], index: 1, kind: input, shape index: {}]   ;;  %s3541_s2 = inlined_call_operand.vmem [shape: s32[2,2], index: 2, kind: input, shape index: {}]  }
   0x1   :  { %3600 = sst [smem:[#allocation39_spill]] %s3538_s7  ;;  %s13_s29 = sshll.u32 %s3533_s0, 4  ;;  %s14_s29 = int_to_ptr.vmem [resolvable:$true] %s13_s29 }
   0x2   :  { %s17_s10 = sshll.u32 %s3540_s1, 4  ;;  %s1922_s11 = scalar_lea.vmem %s14_s29, 32  ;;  %s18_s10 = int_to_ptr.vmem [resolvable:$true] %s17_s10 }
   0x3   :  { %p1923_p0 = scmp.ne.s32.totalorder %s14_s29, %s1922_s11  ;;  %p1927_p1 = scmp.lt.s32.totalorder %s14_s29, %s14_s29 }
   0x4   :  { %p1928_p2 = scmp.lt.s32.totalorder %s1922_s11, %s1922_s11 }
   0x6   :  { %p1929_p3 = por %p1928_p2, %p1927_p1 }
   0x8   :  { %p1930_p4 = pnand %p1929_p3, %p1923_p0 }
   0xa   :  { %1933 = shalt.err (!%p1930_p4)  }
   0xb   :  { %s2073_s12 = smov [#allocation7]   ;;  %s1934_s13 = scalar_lea.vmem %s18_s10, 32 }
   0xc   :  { %16 = dma.vmem_to_smem %s14_s29, 32, %s2073_s12, [#allocation6] }
   0xd   :  { %p1935_p5 = scmp.ne.s32.totalorder %s18_s10, %s1934_s13  ;;  %p1939_p6 = scmp.lt.s32.totalorder %s18_s10, %s18_s10 }
   0xe   :  { %p1940_p7 = scmp.lt.s32.totalorder %s1934_s13, %s1934_s13 }
  0x10   :  { %p1941_p8 = por %p1940_p7, %p1939_p6 }
  0x12   :  { %p1942_p9 = pnand %p1941_p8, %p1935_p5 }
  0x14   :  { %1945 = shalt.err (!%p1942_p9)  }
  0x15   :  { %s2074_s0 = smov [#allocation8]   ;;  %s21_s15 = sshll.u32 %s3541_s2, 4  ;;  %s22_s15 = int_to_ptr.vmem [resolvable:$true] %s21_s15 }
  0x16   :  { %20 = dma.vmem_to_smem %s18_s10, 32, %s2074_s0, [#allocation6] }
  0x17   :  { %s1946_s16 = scalar_lea.vmem %s22_s15, 32  ;;  %p1951_p11 = scmp.lt.s32.totalorder %s22_s15, %s22_s15 }
  0x18   :  { %p1947_p10 = scmp.ne.s32.totalorder %s22_s15, %s1946_s16  ;;  %p1952_p12 = scmp.lt.s32.totalorder %s1946_s16, %s1946_s16 }
  0x1a   :  { %p1953_p13 = por %p1952_p12, %p1951_p11 }
  0x1c   :  { %p1954_p0 = pnand %p1953_p13, %p1947_p10 }
  0x1e   :  { %1957 = shalt.err (!%p1954_p0)  }
  0x1f   :  { %s2075_s17 = smov [#allocation9]  }
  0x20   :  { %24 = dma.vmem_to_smem %s22_s15, 32, %s2075_s17, [#allocation6] }
  0x21   :  { %2031 = dma.done.wait [#allocation6], 96 }
  0x22   :  { %2032 = vsyncadd [#allocation6], 4294967200 }
  0x23   :  { %26 = sfence }
  0x24   :  { %27 = vsyncpa [#allocation12], 0 }
  0x25   :  { %28 = vsyncpa [#allocation11], 0 }
  0x26   :  { %30 = vsyncpa [#allocation11 + $0x1], 0  ;;  %s2138_s18 = smov 0   ;;  %s2140_s19 = smov 0  }
  0x27   :  { %s2142_s2 = smov 0   ;;  %s2144_s20 = smov 0  }
  0x28   :  { %s2146_s21 = smov 0   ;;  %s2148_s22 = smov 0  }
  0x29   :  { %s2150_s23 = smov 0   ;;  %s2152_s24 = smov 0  }
  0x2a LB: > { %s1602_s25 = sadd.s32 4294967295, %s2071_s24   ;;  %s1603_s26 = sadd.s32 4294967294, %s2071_s24   ;;  %s2071_s24 = sphi %s2152_s24, %s36_s24   ;;  %s2067_s23 = sphi %s2150_s23, %s3844_s23   ;;  %s2063_s22 = sphi %s2148_s22, %s3843_s22   ;;  %s2059_s21 = sphi %s2146_s21, %s3842_s21   ;;  %s2055_s20 = sphi %s2144_s20, %s3841_s20   ;;  %s2051_s2 = sphi %s2142_s2, %s3840_s2   ;;  %s2047_s19 = sphi %s2140_s19, %s3839_s19   ;;  %s2043_s18 = sphi %s2138_s18, %s3838_s18  }
  0x2b   : > { %s45_s27 = sadd.s32 1, %s2063_s22  ;;  %s48_s28 = sadd.s32 1, %s2067_s23 }
  0x2c   : > { %p46_p1 = scmp.ge.s32.totalorder %s45_s27, 2  ;;  %s202_s29 = sadd.s32 1, %s2051_s2 }
  0x2d   : > { %p212_p2 = scmp.ne.s32.totalorder %s2051_s2, %s2047_s19  ;;  %p213_p3 = scmp.eq.s32.totalorder %s1602_s25, 3 }
  0x2e   : > { %s3846_s27 = smov (%p46_p1, %s45_s27), 0  ;;  %s3848_s28 = smov (!%p46_p1, %s48_s28), %s2067_s23 }
  0x2f   : > { %3601 = sst [smem:[#allocation17_spill]] %s3846_s27  ;;  %p2188_p4 = por %p213_p3, %p212_p2 }
  0x30   : > { %p218_p5 = scmp.ne.s32.totalorder %s2047_s19, %s2043_s18  ;;  %p50_p6 = scmp.ge.s32.totalorder %s3848_s28, 2 }
  0x31   : > { %p219_p7 = scmp.eq.s32.totalorder %s1603_s26, 3  ;;  %p1608_p8 = scmp.ge.s32.totalorder %s2071_s24, 1 }
  0x32   : > { %p226_p9 = scmp.lt.s32.totalorder %s2071_s24, 5  ;;  %s3850_s28 = smov (%p50_p6, %s3848_s28), 0 }
  0x33   : > { %3603 = sst [smem:[#allocation18_spill]] %s3850_s28  ;;  %p2198_p10 = por %p219_p7, %p218_p5 }
  0x34   : > { %p2202_p11 = pnand %p1608_p8, %p226_p9  ;;  %s199_s11 = ssub.s32 %s2067_s23, %s3850_s28 }
  0x35   : > { %s3604_s9 = scalar_select %p2198_p10, 1, 0 }
  0x36   : > { %p200_p12 = scmp.eq.s32.totalorder %s199_s11, 0  ;;  %p1803_p13 = pneg %p2202_p11 }
  0x37   : > { %p2210_p0 = scmp.eq.s32.totalorder %s1602_s25, 0  ;;  %s3607_s7 = sld [smem:[#allocation39_spill]] }
  0x38   : > { %s2218_s14 = scalar_select %p200_p12, %s2051_s2, %s202_s29  }
  0x39   : > { %p1804_p1 = pnand %p2210_p0, %p1803_p13 }
  0x3b   : > { %p1960_p3 = pneg %p1804_p1 }
  0x3d   : > { %s245_s1 = sshll.u32 %s3607_s7, 4  ;;  %s246_s1 = int_to_ptr.vmem [resolvable:$true] %s245_s1 }
  0x3e   : > { %s1958_s15 = scalar_lea.vmem %s246_s1, 16  ;;  %p1966_p7 = scmp.lt.s32.totalorder %s246_s1, %s246_s1 }
  0x3f   : > { %p1959_p2 = scmp.ne.s32.totalorder %s246_s1, %s1958_s15  ;;  %p1967_p8 = scmp.lt.s32.totalorder %s1958_s15, %s1958_s15 }
  0x41   : > { %p1961_p5 = pnand %p1960_p3, %p1959_p2  ;;  %p1968_p9 = por %p1967_p8, %p1966_p7 }
  0x43   : > { %p1962_p6 = pneg %p1961_p5 }
  0x45   : > { %p1969_p10 = pnand %p1968_p9, %p1962_p6 }
  0x47   : > { %1972 = shalt.err (!%p1969_p10)
}
  0x48   : > { %s2076_s16 = smov [#allocation10]   ;;  %308 = sbr.rel (%p2202_p11) target bundleno = 740 (0x2e4), region = 40 }
  0x49   : > { %1806 = dma.vmem_to_smem (!%p1804_p1), %s246_s1, 16, %s2076_s16, [#allocation12]  }
  0x4d   : > { %2034 = dma.done.wait (%p2210_p0), [#allocation12], 16  }
  0x4e   : > { %2036 = vsyncadd (%p2210_p0), [#allocation12], 4294967280 }
  0x4f   : > { %314 = sfence }
  0x50   : > { %s3543_s17 = sand.u32 1, %s2047_s19   ;;  %s358_s25 = sshra.s32 %s2055_s20, 7 }
  0x51   : > { %s1613_s26 = sshll.u32 %s3543_s17, 5  ;;  %s360_s29 = sadd.s32 %s2059_s21, %s358_s25 }
  0x52   : > { %s1614_s11 = sshll.u32 %s360_s29, 7  ;;  %s363_s10 = sand.u32 127, %s2055_s20 }
  0x53   : > { %s2234_s13 = sadd.s32 %s1614_s11, %s363_s10  ;;  %s2248_s27 = scalar_lea.vmem [#allocation13], %s1613_s26 }
  0x54   : > { %s365_s0 = sld [smem:[#allocation7 + %s2234_s13]]  ;;  %p1620_p12 = scmp.ne.s32.totalorder %s2055_s20, 0 }
  0x55   : > { %s387_s12 = sld [smem:[#allocation8 + %s2234_s13]] }
  0x5a   : > { %s1615_s1 = sshll.u32 %s365_s0, 4 }
  0x5b   : > { %p367_p10 = scmp.lt.s32.totalorder %s1615_s1, 31  ;;  %s1618_s15 = sshll.u32 %s387_s12, 4 }
  0x5c   : > { %p389_p11 = scmp.lt.s32.totalorder %s1618_s15, 31  ;;  %405 = sbr.rel (%p1620_p12) target bundleno = 130 (0x82), region = 48 }
  0x5d   : > { %s3852_s1 = smov (!%p367_p10, %s1615_s1), 31 }
  0x5e   : > { %s3854_s15 = smov (!%p389_p11, %s1618_s15), 31  ;;  %s1616_s16 = sshll.u32 %s3852_s1, 3 }
  0x5f   : > { %s2241_s17 = scalar_lea.vmem %s3534_s3, %s1616_s16  ;;  %s1619_s25 = sshll.u32 %s3854_s15, 3 }
  0x60   : > { %s2246_s10 = scalar_lea.vmem %s3535_s4, %s1619_s25 }
  0x61   : > { %v2077_v0 = vmov 0.0   ;;  %v2078_v1 = vmov inf   ;;  %v2079_v2 = vmov -inf  }
  0x62   : > { %406 = vst [vmem:[#allocation2 + $0x30] sm:$0xff] %v2077_v0  ;;  %407 = vst [vmem:[#allocation2] sm:$0xff] %v2077_v0 }
  0x63   : > { %408 = vst [vmem:[#allocation2 + $0x58] sm:$0xff] %v2077_v0  ;;  %409 = vst [vmem:[#allocation2 + $0x18] sm:$0xff] %v2077_v0 }
  0x64   : > { %410 = vst [vmem:[#allocation2 + $0x50] sm:$0xff] %v2077_v0  ;;  %411 = vst [vmem:[#allocation2 + $0x68] sm:$0xff] %v2077_v0 }
  0x65   : > { %412 = vst [vmem:[#allocation2 + $0x8] sm:$0xff] %v2077_v0  ;;  %413 = vst [vmem:[#allocation2 + $0x48] sm:$0xff] %v2077_v0 }
  0x66   : > { %414 = vst [vmem:[#allocation2 + $0x40] sm:$0xff] %v2077_v0  ;;  %415 = vst [vmem:[#allocation2 + $0x20] sm:$0xff] %v2077_v0 }
  0x67   : > { %416 = vst [vmem:[#allocation2 + $0x10] sm:$0xff] %v2077_v0  ;;  %417 = vst [vmem:[#allocation2 + $0x38] sm:$0xff] %v2077_v0 }
  0x68   : > { %418 = vst [vmem:[#allocation2 + $0x60] sm:$0xff] %v2077_v0  ;;  %419 = vst [vmem:[#allocation2 + $0x70] sm:$0xff] %v2077_v0 }
  0x69   : > { %420 = vst [vmem:[#allocation2 + $0x78] sm:$0xff] %v2077_v0  ;;  %421 = vst [vmem:[#allocation2 + $0x28] sm:$0xff] %v2077_v0 }
  0x6a   : > { %422 = vst [vmem:[#allocation3 + $0x28] sm:$0xff] %v2077_v0  ;;  %423 = vst [vmem:[#allocation3 + $0x68] sm:$0xff] %v2077_v0 }
  0x6b   : > { %424 = vst [vmem:[#allocation3 + $0x10] sm:$0xff] %v2077_v0  ;;  %425 = vst [vmem:[#allocation3 + $0x40] sm:$0xff] %v2077_v0 }
  0x6c   : > { %426 = vst [vmem:[#allocation3 + $0x48] sm:$0xff] %v2077_v0  ;;  %427 = vst [vmem:[#allocation3 + $0x30] sm:$0xff] %v2077_v0 }
  0x6d   : > { %428 = vst [vmem:[#allocation3 + $0x70] sm:$0xff] %v2077_v0  ;;  %429 = vst [vmem:[#allocation3 + $0x38] sm:$0xff] %v2077_v0 }
  0x6e   : > { %430 = vst [vmem:[#allocation3 + $0x20] sm:$0xff] %v2077_v0  ;;  %431 = vst [vmem:[#allocation3 + $0x78] sm:$0xff] %v2077_v0 }
  0x6f   : > { %432 = vst [vmem:[#allocation3 + $0x18] sm:$0xff] %v2077_v0  ;;  %433 = vst [vmem:[#allocation3 + $0x58] sm:$0xff] %v2077_v0 }
  0x70   : > { %434 = vst [vmem:[#allocation3] sm:$0xff] %v2077_v0  ;;  %435 = vst [vmem:[#allocation3 + $0x8] sm:$0xff] %v2077_v0 }
  0x71   : > { %436 = vst [vmem:[#allocation3 + $0x60] sm:$0xff] %v2077_v0  ;;  %437 = vst [vmem:[#allocation3 + $0x50] sm:$0xff] %v2077_v0 }
  0x72   : > { %438 = vst [vmem:[#allocation4 + $0x8] sm:$0xff] %v2078_v1  ;;  %439 = vst [vmem:[#allocation4] sm:$0xff] %v2078_v1 }
  0x73   : > { %440 = vst [vmem:[#allocation4 + $0x48] sm:$0xff] %v2078_v1  ;;  %441 = vst [vmem:[#allocation4 + $0x60] sm:$0xff] %v2078_v1 }
  0x74   : > { %442 = vst [vmem:[#allocation4 + $0x68] sm:$0xff] %v2078_v1  ;;  %443 = vst [vmem:[#allocation4 + $0x18] sm:$0xff] %v2078_v1 }
  0x75   : > { %444 = vst [vmem:[#allocation4 + $0x10] sm:$0xff] %v2078_v1  ;;  %445 = vst [vmem:[#allocation4 + $0x38] sm:$0xff] %v2078_v1 }
  0x76   : > { %446 = vst [vmem:[#allocation4 + $0x40] sm:$0xff] %v2078_v1  ;;  %447 = vst [vmem:[#allocation4 + $0x28] sm:$0xff] %v2078_v1 }
  0x77   : > { %448 = vst [vmem:[#allocation4 + $0x70] sm:$0xff] %v2078_v1  ;;  %449 = vst [vmem:[#allocation4 + $0x20] sm:$0xff] %v2078_v1 }
  0x78   : > { %450 = vst [vmem:[#allocation4 + $0x58] sm:$0xff] %v2078_v1  ;;  %451 = vst [vmem:[#allocation4 + $0x30] sm:$0xff] %v2078_v1 }
  0x79   : > { %452 = vst [vmem:[#allocation4 + $0x50] sm:$0xff] %v2078_v1  ;;  %453 = vst [vmem:[#allocation4 + $0x78] sm:$0xff] %v2078_v1 }
  0x7a   : > { %454 = vst [vmem:[#allocation5 + $0x18] sm:$0xff] %v2079_v2  ;;  %455 = vst [vmem:[#allocation5 + $0x38] sm:$0xff] %v2079_v2 }
  0x7b   : > { %456 = vst [vmem:[#allocation5 + $0x48] sm:$0xff] %v2079_v2  ;;  %457 = vst [vmem:[#allocation5 + $0x40] sm:$0xff] %v2079_v2 }
  0x7c   : > { %458 = vst [vmem:[#allocation5 + $0x28] sm:$0xff] %v2079_v2  ;;  %459 = vst [vmem:[#allocation5] sm:$0xff] %v2079_v2 }
  0x7d   : > { %460 = vst [vmem:[#allocation5 + $0x8] sm:$0xff] %v2079_v2  ;;  %461 = vst [vmem:[#allocation5 + $0x70] sm:$0xff] %v2079_v2 }
  0x7e   : > { %462 = vst [vmem:[#allocation5 + $0x68] sm:$0xff] %v2079_v2  ;;  %463 = vst [vmem:[#allocation5 + $0x60] sm:$0xff] %v2079_v2 }
  0x7f   : > { %464 = vst [vmem:[#allocation5 + $0x78] sm:$0xff] %v2079_v2  ;;  %465 = vst [vmem:[#allocation5 + $0x30] sm:$0xff] %v2079_v2 }
  0x80   : > { %466 = vst [vmem:[#allocation5 + $0x50] sm:$0xff] %v2079_v2  ;;  %467 = vst [vmem:[#allocation5 + $0x20] sm:$0xff] %v2079_v2 }
  0x81   : > { %468 = vst [vmem:[#allocation5 + $0x58] sm:$0xff] %v2079_v2  ;;  %469 = vst [vmem:[#allocation5 + $0x10] sm:$0xff] %v2079_v2 }
  0x82 PF: > { %v514_v3 = vld [vmem:[%s2246_s10 + $0x78] sm:$0xff]  ;;  %vm515_vm0 = vcmask 523264   ;;  %v513_v4 = vld [vmem:[%s2246_s10 + $0x70] sm:$0xff]  ;;  %s2254_s7 = sld [smem:[#allocation7 + %s2234_s13]]  ;;  %v512_v5 = vld [vmem:[%s2246_s10 + $0x68] sm:$0xff]  ;;  %v2080_v6 = vmov 0   ;;  %v845_v60 = vlaneseq }
  0x83   : > { %1701 = vmatprep.subr.msk.mxu0 %vm515_vm0, %v514_v3  ;;  %1757 = vmatprep.subr.msk.mxu1 %vm515_vm0, %v514_v3  ;;  %v483_v7 = vld [vmem:[%s2241_s17] sm:$0xff]  ;;  %v510_v12 = vld [vmem:[%s2246_s10 + $0x58] sm:$0xff]  ;;  %v509_v15 = vld [vmem:[%s2246_s10 + $0x50] sm:$0xff]  ;;  %s2393_s1 = sld [smem:[#allocation8 + %s2234_s13]]  ;;  %p1659_p5 = scmp.ne.s32.totalorder %s2055_s20, 1 }
  0x84   : > { %1702 = vmatpush3.xpose.msk.msra.mxu0 %vm515_vm0, %v514_v3  ;;  %1773 = vmatpush3.xpose.msk.msra.mxu1 %vm515_vm0, %v514_v3  ;;  %v491_v8 = vld [vmem:[%s2241_s17 + $0x40] sm:$0xff]  ;;  %v508_v18 = vld [vmem:[%s2246_s10 + $0x48] sm:$0xff]  ;;  %v506_v24 = vld [vmem:[%s2246_s10 + $0x38] sm:$0xff]  ;;  %s481_s15 = sld [smem:[#allocation9 + %s2234_s13]]  ;;  %v848_v61 = vshrl.u32 %v845_v60, 7  ;;  %v2424_v0 = vand.u32 127, %v845_v60 }
  0x85   : > { %1703 = vmatprep.subr.msk.mxu0 %vm515_vm0, %v513_v4  ;;  %1758 = vmatprep.subr.msk.mxu1 %vm515_vm0, %v513_v4  ;;  %v511_v9 = vld [vmem:[%s2246_s10 + $0x60] sm:$0xff]  ;;  %v505_v27 = vld [vmem:[%s2246_s10 + $0x30] sm:$0xff]  ;;  %v504_v30 = vld [vmem:[%s2246_s10 + $0x28] sm:$0xff]  ;;  %s2418_s13 = sld [smem:[#allocation10 + $0x1]]  ;;  %v3645_v60 = vmov 0 }
  0x86   : > { %1889 = vset.pattern.permute.xlu1 %v2080_v6  ;;  %1888 = vset.pattern.permute.xlu0 %v2080_v6  ;;  %v507_v21 = vld [vmem:[%s2246_s10 + $0x40] sm:$0xff]  ;;  %v502_v34 = vld [vmem:[%s2246_s10 + $0x18] sm:$0xff]  ;;  %v501_v35 = vld [vmem:[%s2246_s10 + $0x10] sm:$0xff]  ;;  %v849_v2 = vadd.s32 8, %v848_v61  ;;  %v850_v3 = vadd.s32 16, %v848_v61  ;;  %vm864_vm2 = vcmp.gt.s32.totalorder %v2424_v0, %v848_v61 }
  0x87   : > { %1733 = vmatprep.mubr.msk.f32.mxu0 %vm515_vm0, %v483_v7  ;;  %1745 = vmatprep.mubr.msk.f32.mxu1 %vm515_vm0, %v491_v8  ;;  %v503_v33 = vld [vmem:[%s2246_s10 + $0x20] sm:$0xff]  ;;  %v500_v36 = vld [vmem:[%s2246_s10 + $0x8] sm:$0xff]  ;;  %v485_v40 = vld [vmem:[%s2241_s17 + $0x10] sm:$0xff]  ;;  %v852_v7 = vadd.s32 32, %v848_v61 }
  0x88   : > { %1704 = vmatpush3.xpose.msk.msra.mxu0 %vm515_vm0, %v513_v4  ;;  %1774 = vmatpush3.xpose.msk.msra.mxu1 %vm515_vm0, %v513_v4  ;;  %s1655_s28 = sshll.u32 %s2254_s7, 7  ;;  %v499_v37 = vld [vmem:[%s2246_s10] sm:$0xff]  ;;  %v484_v38 = vld [vmem:[%s2241_s17 + $0x8] sm:$0xff]  ;;  %v493_v41 = vld [vmem:[%s2241_s17 + $0x50] sm:$0xff]  ;;  %v851_v4 = vadd.s32 24, %v848_v61  ;;  %vm865_vm3 = vcmp.gt.s32.totalorder %v2424_v0, %v849_v2  ;;  %vm866_vm4 = vcmp.gt.s32.totalorder %v2424_v0, %v850_v3 }
  0x89   : > { %1705 = vmatprep.subr.msk.mxu0 %vm515_vm0, %v512_v5  ;;  %1759 = vmatprep.subr.msk.mxu1 %vm515_vm0, %v512_v5  ;;  %s2273_s12 = scalar_lea.vmem %s3536_s5, %s1655_s28  ;;  %v492_v39 = vld [vmem:[%s2241_s17 + $0x48] sm:$0xff]  ;;  %v486_v42 = vld [vmem:[%s2241_s17 + $0x18] sm:$0xff]  ;;  %v487_v44 = vld [vmem:[%s2241_s17 + $0x20] sm:$0xff]  ;;  %p883_p0 = scmp.eq.s32.totalorder %s2393_s1, %s2254_s7 }
  0x8a   : > { %v761_v10 = vld [vmem:[%s2273_s12 + $0x10] sm:$0xff]  ;;  %v759_v11 = vld [vmem:[%s2273_s12] sm:$0xff]  ;;  %v762_v13 = vld [vmem:[%s2273_s12 + $0x18] sm:$0xff]  ;;  %p482_p13 = scmp.gt.s32.totalorder %s481_s15, 0  ;;  %p880_p1 = scmp.gt.s32.totalorder %s2393_s1, %s2254_s7  ;;  %vm867_vm5 = vcmp.gt.s32.totalorder %v2424_v0, %v851_v4  ;;  %v3650_v4 = vmov 0 }
  0x8b   : > { %784 = vperm.xlu1 %1889, %v761_v10   ;;  %778 = vperm.xlu0 %1888, %v759_v11   ;;  %v760_v14 = vld [vmem:[%s2273_s12 + $0x8] sm:$0xff]  ;;  %v763_v17 = vld [vmem:[%s2273_s12 + $0x20] sm:$0xff]  ;;  %v766_v19 = vld [vmem:[%s2273_s12 + $0x38] sm:$0xff]  ;;  %s775_s7 = scalar_lea.vmem %s3537_s6, %s2393_s1  ;;  %s956_s26 = ssub.f32 0.0, %s2418_s13  ;;  %v857_v10 = vadd.s32 72, %v848_v61  ;;  %v856_v11 = vadd.s32 64, %v848_v61 }
  0x8c   : > { %1706 = vmatpush3.xpose.msk.msra.mxu0 %vm515_vm0, %v512_v5  ;;  %1775 = vmatpush3.xpose.msk.msra.mxu1 %vm515_vm0, %v512_v5  ;;  %v764_v16 = vld [vmem:[%s2273_s12 + $0x28] sm:$0xff]  ;;  %v765_v20 = vld [vmem:[%s2273_s12 + $0x30] sm:$0xff]  ;;  %v767_v23 = vld [vmem:[%s2273_s12 + $0x40] sm:$0xff]  ;;  %p884_p2 = pnand %p883_p0, %p482_p13  ;;  %p2414_p3 = pnand %p880_p1, %p482_p13  ;;  %v853_v5 = vadd.s32 40, %v848_v61 }
  0x8d   : > { %1707 = vmatprep.subr.msk.mxu0 %vm515_vm0, %v511_v9  ;;  %1760 = vmatprep.subr.msk.mxu1 %vm515_vm0, %v511_v9  ;;  %v768_v22 = vld [vmem:[%s2273_s12 + $0x48] sm:$0xff]  ;;  %v770_v25 = vld [vmem:[%s2273_s12 + $0x58] sm:$0xff]  ;;  %v769_v26 = vld [vmem:[%s2273_s12 + $0x50] sm:$0xff]  ;;  %vm873_vm13 = vcmp.gt.s32.totalorder %v2424_v0, %v857_v10  ;;  %vm872_vm14 = vcmp.gt.s32.totalorder %v2424_v0, %v856_v11  ;;  %v3657_v10 = vmov 0 }
  0x8e   : > { %v772_v28 = vld [vmem:[%s2273_s12 + $0x68] sm:$0xff]  ;;  %v771_v29 = vld [vmem:[%s2273_s12 + $0x60] sm:$0xff]  ;;  %v774_v31 = vld [vmem:[%s2273_s12 + $0x78] sm:$0xff]  ;;  %s1657_s25 = scalar_select %p884_p2, 0, 1  ;;  %vm869_vm8 = vcmp.gt.s32.totalorder %v2424_v0, %v853_v5 }
  0x8f   : > { %787 = vperm.xlu1 %1889, %v762_v13   ;;  %781 = vperm.xlu0 %1888, %v760_v14   ;;  %v773_v32 = vld [vmem:[%s2273_s12 + $0x70] sm:$0xff]  ;;  %v494_v43 = vld [vmem:[%s2241_s17 + $0x58] sm:$0xff]  ;;  %v495_v45 = vld [vmem:[%s2241_s17 + $0x60] sm:$0xff]  ;;  %s1658_s29 = scalar_select %p2414_p3, 0, 1  ;;  %v2449_v14 = vadd.s32 80, %v848_v61 }
  0x90   : > { %1708 = vmatpush3.xpose.msk.msra.mxu0 %vm515_vm0, %v511_v9  ;;  %1776 = vmatpush3.xpose.msk.msra.mxu1 %vm515_vm0, %v511_v9  ;;  %v488_v46 = vld [vmem:[%s2241_s17 + $0x28] sm:$0xff]  ;;  %v489_v48 = vld [vmem:[%s2241_s17 + $0x30] sm:$0xff]  ;;  %v490_v50 = vld [vmem:[%s2241_s17 + $0x38] sm:$0xff]  ;;  %v2428_v1 = vstv %s1657_s25 }
  0x91   : > { %1709 = vmatprep.subr.msk.mxu0 %vm515_vm0, %v510_v12  ;;  %1761 = vmatprep.subr.msk.mxu1 %vm515_vm0, %v510_v12  ;;  %v496_v47 = vld [vmem:[%s2241_s17 + $0x68] sm:$0xff]  ;;  %v497_v49 = vld [vmem:[%s2241_s17 + $0x70] sm:$0xff]  ;;  %v498_v51 = vld [vmem:[%s2241_s17 + $0x78] sm:$0xff]  ;;  %s2412_s17 = sld [smem:[#allocation10]]  ;;  %vm3553_vm1 = vcmp.eq.s32.totalorder %v2428_v1, 1  ;;  %v2436_v6 = vstv %s1658_s29 }
  0x92   : > { %v2445_v13 = vld [vmem:[%s775_s7] ss:$0 sm:$0xff]  ;;  %vm3551_vm6 = vcmp.eq.s32.totalorder %v2436_v6, 1  ;;  %vm889_vm7 = vmand %vm3553_vm1, %vm864_vm2 }
  0x93   : > { %793 = vperm.xlu1 %1889, %v764_v16   ;;  %790 = vperm.xlu0 %1888, %v763_v17   ;;  %vm2470_vm9 = vmand %vm3553_vm1, %vm865_vm3 }
  0x94   : > { %1710 = vmatpush3.xpose.msk.msra.mxu0 %vm515_vm0, %v510_v12  ;;  %1777 = vmatpush3.xpose.msk.msra.mxu1 %vm515_vm0, %v510_v12  ;;  %v859_v12 = vadd.s32 88, %v848_v61  ;;  %vm2481_vm11 = vmand %vm3553_vm1, %vm866_vm4 }
  0x95   : > { %1711 = vmatprep.subr.msk.mxu0 %vm515_vm0, %v509_v15  ;;  %1762 = vmatprep.subr.msk.mxu1 %vm515_vm0, %v509_v15  ;;  %vm2502_vm3 = vmand %vm3553_vm1, %vm867_vm5 }
  0x96   : > { %vm2520_vm5 = vmor %vm3551_vm6, %vm2470_vm9 }
  0x97   : > { %799 = vperm.xlu1 %1889, %v766_v19   ;;  %796 = vperm.xlu0 %1888, %v765_v20   ;;  %s975_s28 = ssub.f32 0.0, %s2412_s17  ;;  %v2455_v16 = vstv %s2412_s17  ;;  %v2475_v20 = vadd.s32 56, %v848_v61  ;;  %vm2550_vm9 = vmand %vm3553_vm1, %vm869_vm8  ;;  %v3665_v19 = vmov 0 }
  0x98   : > { %1712 = vmatpush3.xpose.msk.msra.mxu0 %vm515_vm0, %v509_v15  ;;  %1778 = vmatpush3.xpose.msk.msra.mxu1 %vm515_vm0, %v509_v15  ;;  %v2451_v15 = vadd.s32 104, %v848_v61  ;;  %vm2630_vm8 = vmor %vm3551_vm6, %vm2502_vm3 }
  0x99   : > { %1713 = vmatprep.subr.msk.mxu0 %vm515_vm0, %v508_v18  ;;  %1763 = vmatprep.subr.msk.mxu1 %vm515_vm0, %v508_v18  ;;  %v2457_v17 = vstv %s975_s28 }
  0x9b   : > { %805 = vperm.xlu1 %1889, %v768_v22   ;;  %802 = vperm.xlu0 %1888, %v767_v23   ;;  %v3615_v23 = vmov 0 }
  0x9c   : > { %1714 = vmatpush3.xpose.msk.msra.mxu0 %vm515_vm0, %v508_v18  ;;  %1779 = vmatpush3.xpose.msk.msra.mxu1 %vm515_vm0, %v508_v18  ;;  %v2464_v18 = vstv %s956_s26 }
  0x9d   : > { %1715 = vmatprep.subr.msk.mxu0 %vm515_vm0, %v507_v21  ;;  %1764 = vmatprep.subr.msk.mxu1 %vm515_vm0, %v507_v21 }
  0x9f   : > { %811 = vperm.xlu1 %1889, %v770_v25   ;;  %808 = vperm.xlu0 %1888, %v769_v26  }
  0xa0   : > { %1716 = vmatpush3.xpose.msk.msra.mxu0 %vm515_vm0, %v507_v21  ;;  %1780 = vmatpush3.xpose.msk.msra.mxu1 %vm515_vm0, %v507_v21  ;;  %v2477_v21 = vadd.s32 48, %v848_v61 }
  0xa1   : > { %1717 = vmatprep.subr.msk.mxu0 %vm515_vm0, %v506_v24  ;;  %1765 = vmatprep.subr.msk.mxu1 %vm515_vm0, %v506_v24 }
  0xa3   : > { %817 = vperm.xlu1 %1889, %v772_v28   ;;  %814 = vperm.xlu0 %1888, %v771_v29   ;;  %v2526_v28 = vadd.s32 96, %v848_v61  ;;  %v2528_v29 = vadd.s32 120, %v848_v61 }
  0xa4   : > { %1718 = vmatpush3.xpose.msk.msra.mxu0 %vm515_vm0, %v506_v24  ;;  %1781 = vmatpush3.xpose.msk.msra.mxu1 %vm515_vm0, %v506_v24 }
  0xa5   : > { %1719 = vmatprep.subr.msk.mxu0 %vm515_vm0, %v505_v27  ;;  %1766 = vmatprep.subr.msk.mxu1 %vm515_vm0, %v505_v27 }
  0xa7   : > { %823 = vperm.xlu1 %1889, %v774_v31   ;;  %820 = vperm.xlu0 %1888, %v773_v32  }
  0xa8   : > { %1720 = vmatpush3.xpose.msk.msra.mxu0 %vm515_vm0, %v505_v27  ;;  %1782 = vmatpush3.xpose.msk.msra.mxu1 %vm515_vm0, %v505_v27  ;;  %v3620_v27 = vmov 0 }
  0xa9   : > { %1721 = vmatprep.subr.msk.mxu0 %vm515_vm0, %v504_v30  ;;  %1767 = vmatprep.subr.msk.mxu1 %vm515_vm0, %v504_v30  ;;  %v3621_v27 = vsel %vm2520_vm5, 4294967295, %v3620_v27 }
  0xaa   : > { %3622 = vst [vmem:[#allocation22_spill] sm:$0xff] %v3621_v27  ;;  %v1185_v27 = vld [vmem:[#allocation4 + $0x8] sm:$0xff] }
  0xac   : > { %1722 = vmatpush3.xpose.msk.msra.mxu0 %vm515_vm0, %v504_v30  ;;  %1783 = vmatpush3.xpose.msk.msra.mxu1 %vm515_vm0, %v504_v30  ;;  %v2530_v30 = vadd.s32 112, %v848_v61 }
  0xad   : > { %1723 = vmatprep.subr.msk.mxu0 %vm515_vm0, %v503_v33  ;;  %1768 = vmatprep.subr.msk.mxu1 %vm515_vm0, %v503_v33 }
  0xb0   : > { %1724 = vmatpush3.xpose.msk.msra.mxu0 %vm515_vm0, %v503_v33  ;;  %1784 = vmatpush3.xpose.msk.msra.mxu1 %vm515_vm0, %v503_v33 }
  0xb1   : > { %1725 = vmatprep.subr.msk.mxu0 %vm515_vm0, %v502_v34  ;;  %1769 = vmatprep.subr.msk.mxu1 %vm515_vm0, %v502_v34 }
  0xb4   : > { %1726 = vmatpush3.xpose.msk.msra.mxu0 %vm515_vm0, %v502_v34  ;;  %1785 = vmatpush3.xpose.msk.msra.mxu1 %vm515_vm0, %v502_v34 }
  0xb5   : > { %1727 = vmatprep.subr.msk.mxu0 %vm515_vm0, %v501_v35  ;;  %1770 = vmatprep.subr.msk.mxu1 %vm515_vm0, %v501_v35 }
  0xb8   : > { %1728 = vmatpush3.xpose.msk.msra.mxu0 %vm515_vm0, %v501_v35  ;;  %1786 = vmatpush3.xpose.msk.msra.mxu1 %vm515_vm0, %v501_v35 }
  0xb9   : > { %1729 = vmatprep.subr.msk.mxu0 %vm515_vm0, %v500_v36  ;;  %1771 = vmatprep.subr.msk.mxu1 %vm515_vm0, %v500_v36 }
  0xbc   : > { %1730 = vmatpush3.xpose.msk.msra.mxu0 %vm515_vm0, %v500_v36  ;;  %1787 = vmatpush3.xpose.msk.msra.mxu1 %vm515_vm0, %v500_v36 }
  0xbd   : > { %1731 = vmatprep.subr.msk.mxu0 %vm515_vm0, %v499_v37  ;;  %1772 = vmatprep.subr.msk.mxu1 %vm515_vm0, %v499_v37 }
  0xc0   : > { %1732 = vmatpush3.xpose.msk.msra.mxu0 %vm515_vm0, %v499_v37  ;;  %1788 = vmatpush3.xpose.msk.msra.mxu1 %vm515_vm0, %v499_v37 }
  0xc3   : > { %1734 = vmatmul.mubr.msk.f32.vlgmr.msra.gmra.mxu0 %vm515_vm0, %v484_v38  ;;  %1746 = vmatmul.mubr.msk.f32.vlgmr.msra.gmra.mxu1 %vm515_vm0, %v492_v39 }
  0xc4   : > { %1736 = vmatprep.mubr.msk.f32.mxu0 %vm515_vm0, %v485_v40  ;;  %1748 = vmatprep.mubr.msk.f32.mxu1 %vm515_vm0, %v493_v41 }
  0xc7   : > { %1737 = vmatmul.mubr.msk.f32.gmra.mxu0 %vm515_vm0, %v486_v42  ;;  %1749 = vmatmul.mubr.msk.f32.gmra.mxu1 %vm515_vm0, %v494_v43  ;;  %v3632_v43 = vmov 0  ;;  %v3678_v42 = vmov 0 }
  0xc8   : > { %1739 = vmatprep.mubr.msk.f32.mxu0 %vm515_vm0, %v487_v44  ;;  %1751 = vmatprep.mubr.msk.f32.mxu1 %vm515_vm0, %v495_v45  ;;  %v3633_v43 = vsel %vm2630_vm8, 4294967295, %v3632_v43 }
  0xcb   : > { %1740 = vmatmul.mubr.msk.f32.gmra.mxu0 %vm515_vm0, %v488_v46  ;;  %1752 = vmatmul.mubr.msk.f32.gmra.mxu1 %vm515_vm0, %v496_v47  ;;  %v3635_v47 = vmov 0 }
  0xcc   : > { %1742 = vmatprep.mubr.msk.f32.mxu0 %vm515_vm0, %v489_v48  ;;  %1754 = vmatprep.mubr.msk.f32.mxu1 %vm515_vm0, %v497_v49  ;;  %v3638_v48 = vmov 0 }
  0xcf   : > { %1743 = vmatmul.mubr.msk.f32.gmra.mxu0 %vm515_vm0, %v490_v50  ;;  %1755 = vmatmul.mubr.msk.f32.gmra.mxu1 %vm515_vm0, %v498_v51  ;;  %vm2492_vm0 = vmor %vm3551_vm6, %vm889_vm7 }
  0xd0   : > { %v3616_v23 = vsel %vm2492_vm0, 4294967295, %v3615_v23 }
 0x106   : > { %v2388_v52 = vpop.permute.xlu1 %784  ;;  %v2390_v53 = vpop.permute.xlu0 %778 }
 0x107   : > { %vm3544_vm12 = vcmp.eq.s32.totalorder %v2388_v52, %v2445_v13  ;;  %vm3545_vm2 = vcmp.eq.s32.totalorder %v2390_v53, %v2445_v13 }
 0x108   : > { %v2537_v31 = vsel %vm3544_vm12, %v2464_v18, %v2455_v16  ;;  %v2544_v32 = vsel %vm3544_vm12, %v2464_v18, %v2457_v17  ;;  %vm2562_vm12 = vmand %vm3553_vm1, %vm873_vm13  ;;  %v2571_v35 = vsel %vm3545_vm2, %v2464_v18, %v2455_v16  ;;  %v2578_v36 = vsel %vm3545_vm2, %v2464_v18, %v2457_v17 }
 0x109   : > { %vm2593_vm13 = vmand %vm3553_vm1, %vm872_vm14  ;;  %vm3629_vm2 = vcmp.gt.s32.totalorder %v2424_v0, %v859_v12 }
 0x10a   : > { %v2395_v54 = vpop.permute.xlu1 %787  ;;  %v2397_v55 = vpop.permute.xlu0 %781 }
 0x10b   : > { %vm3546_vm4 = vcmp.eq.s32.totalorder %v2395_v54, %v2445_v13  ;;  %vm3548_vm15 = vcmp.eq.s32.totalorder %v2397_v55, %v2445_v13 }
 0x10c   : > { %v2585_v37 = vsel %vm3546_vm4, %v2464_v18, %v2455_v16  ;;  %v2602_v39 = vsel %vm3546_vm4, %v2464_v18, %v2457_v17  ;;  %v960_v40 = vsel %vm3548_vm15, %v2464_v18, %v2455_v16  ;;  %v2614_v41 = vsel %vm3548_vm15, %v2464_v18, %v2457_v17  ;;  %vm2622_vm4 = vmand %vm3553_vm1, %vm3629_vm2 }
 0x10d   : > { %vm2659_vm2 = vmor %vm3551_vm6, %vm2562_vm12 }
 0x10e   : > { %v2400_v56 = vpop.permute.xlu1 %793  ;;  %v2402_v57 = vpop.permute.xlu0 %790  ;;  %v3636_v47 = vsel %vm2659_vm2, 4294967295, %v3635_v47 }
 0x10f   : > { %vm3547_vm10 = vcmp.eq.s32.totalorder %v2400_v56, %v2445_v13  ;;  %vm3549_vm7 = vcmp.eq.s32.totalorder %v2402_v57, %v2445_v13 }
 0x110   : > { %v2639_v44 = vsel %vm3547_vm10, %v2464_v18, %v2455_v16  ;;  %v2646_v45 = vsel %vm3547_vm10, %v2464_v18, %v2457_v17  ;;  %v2653_v46 = vsel %vm3549_vm7, %v2464_v18, %v2455_v16  ;;  %vm3637_vm10 = vcmp.gt.s32.totalorder %v2424_v0, %v852_v7 }
 0x111   : > { %3634 = vst [vmem:[#allocation23_spill] sm:$0xff] %v2653_v46  ;;  %vm2669_vm15 = vmand %vm3553_vm1, %vm3637_vm10  ;;  %v2678_v49 = vsel %vm3549_vm7, %v2464_v18, %v2457_v17  ;;  %v1258_v46 = vld [vmem:[#allocation5 + $0x60] sm:$0xff] }
 0x112   : > { %v2408_v58 = vpop.permute.xlu1 %799  ;;  %v2410_v59 = vpop.permute.xlu0 %796  ;;  %v3639_v48 = vsel %vm2669_vm15, 4294967295, %v3638_v48  ;;  %3640 = vst [vmem:[#allocation24_spill] sm:$0xff] %v2678_v49  ;;  %vm2698_vm7 = vmor %vm3551_vm6, %vm2593_vm13 }
 0x113   : > { %3608 = vst [vmem:[#allocation19_spill] sm:$0xff] %v2408_v58  ;;  %3609 = vst [vmem:[#allocation20_spill] sm:$0xff] %v2410_v59  ;;  %vm3550_vm14 = vcmp.eq.s32.totalorder %v2410_v59, %v2445_v13  ;;  %vm3641_vm12 = vcmp.eq.s32.totalorder %v2408_v58, %v2445_v13  ;;  %v3646_v60 = vsel %vm2698_vm7, 4294967295, %v3645_v60 }
 0x114   : > { %v2685_v50 = vsel %vm3641_vm12, %v2464_v18, %v2455_v16  ;;  %vm3643_vm10 = vmmov %vm3641_vm12  ;;  %v2713_v3 = vsel %vm3550_vm14, %v2464_v18, %v2457_v17  ;;  %vm3661_vm14 = vcmp.gt.s32.totalorder %v2424_v0, %v2451_v15 }
 0x115   : > { %3642 = vst [vmem:[#allocation25_spill] sm:$0xff] %v2685_v50  ;;  %v2692_v51 = vsel %vm3643_vm10, %v2464_v18, %v2457_v17  ;;  %3649 = vst [vmem:[#allocation29_spill] sm:$0xff] %v2713_v3  ;;  %vm3652_vm10 = vcmp.gt.s32.totalorder %v2424_v0, %v2449_v14  ;;  %v3681_v3 = vmov 0  ;;  %v1250_v50 = vld [vmem:[#allocation5 + $0x38] sm:$0xff] }
 0x116   : > { %v2420_v62 = vpop.permute.xlu1 %805  ;;  %v2422_v63 = vpop.permute.xlu0 %802  ;;  %3644 = vst [vmem:[#allocation26_spill] sm:$0xff] %v2692_v51  ;;  %vm2719_vm13 = vmor %vm3551_vm6, %vm2622_vm4  ;;  %vm3655_vm4 = vcmp.eq.s32.totalorder %v2410_v59, %v2445_v13  ;;  %v1186_v51 = vld [vmem:[#allocation4] sm:$0xff] }
 0x117   : > { %v3651_v4 = vsel %vm2719_vm13, 4294967295, %v3650_v4  ;;  %vm2730_vm3 = vmand %vm3553_vm1, %vm3652_vm10  ;;  %v2741_v7 = vsel %vm3655_vm4, %v2464_v18, %v2455_v16  ;;  %vm3659_vm10 = vcmp.eq.s32.totalorder %v2420_v62, %v2445_v13 }
 0x118   : > { %3656 = vst [vmem:[#allocation30_spill] sm:$0xff] %v2741_v7  ;;  %vm2747_vm12 = vmor %vm3551_vm6, %vm2481_vm11  ;;  %v968_v11 = vsel %vm3659_vm10, %v2464_v18, %v2455_v16 }
 0x119   : > { %v3658_v10 = vsel %vm2747_vm12, 4294967295, %v3657_v10  ;;  %vm3660_vm4 = vmmov %vm3659_vm10 }
 0x11a   : > { %v2440_v8 = vpop.permute.xlu1 %811  ;;  %v2442_v9 = vpop.permute.xlu0 %808  ;;  %v986_v12 = vsel %vm3660_vm4, %v2464_v18, %v2457_v17  ;;  %vm2766_vm11 = vmand %vm3553_vm1, %vm3661_vm14  ;;  %vm3664_vm4 = vcmp.eq.s32.totalorder %v2397_v55, %v2445_v13  ;;  %vm3668_vm14 = vcmp.eq.s32.totalorder %v2422_v63, %v2445_v13  ;;  %v3671_v55 = vmov 0 }
 0x11b   : > { %vm2779_vm12 = vmand %vm3664_vm4, %vm2520_vm5  ;;  %v967_v15 = vsel %vm3668_vm14, %v2464_v18, %v2455_v16 }
 0x11c   : > { %v3666_v19 = vsel %vm2779_vm12, 4294967295, %v3665_v19  ;;  %vm3669_vm1 = vmmov %vm3668_vm14 }
 0x11d   : > { %3667 = vst [vmem:[#allocation31_spill] sm:$0xff] %v3666_v19  ;;  %v2793_v22 = vsel %vm3669_vm1, %v2464_v18, %v2457_v17  ;;  %vm3670_vm6 = vmmov %vm3659_vm10  ;;  %vm3673_vm1 = vcmp.eq.s32.totalorder %v2440_v8, %v2445_v13  ;;  %v1249_v19 = vld [vmem:[#allocation5 + $0x18] sm:$0xff] }
 0x11e   : > { %v2512_v25 = vpop.permute.xlu1 %817  ;;  %v2514_v26 = vpop.permute.xlu0 %814  ;;  %vm2804_vm13 = vmand %vm3670_vm6, %vm2659_vm2  ;;  %v2813_v24 = vsel %vm3673_vm1, %v2464_v18, %v2455_v16  ;;  %vm3675_vm6 = vcmp.eq.s32.totalorder %v2442_v9, %v2445_v13 }
 0x11f   : > { %3619 = vst [vmem:[#allocation21_spill] sm:$0xff] %v2514_v26  ;;  %v3672_v55 = vsel %vm2804_vm13, 4294967295, %v3671_v55  ;;  %vm3674_vm14 = vmmov %vm3673_vm1  ;;  %v2827_v62 = vsel %vm3675_vm6, %v2464_v18, %v2455_v16  ;;  %vm3683_vm4 = vcmp.eq.s32.totalorder %v2512_v25, %v2445_v13 }
 0x120   : > { %v2820_v34 = vsel %vm3674_vm14, %v2464_v18, %v2457_v17  ;;  %vm3676_vm1 = vmmov %vm3675_vm6  ;;  %vm3677_vm14 = vcmp.eq.s32.totalorder %v2390_v53, %v2445_v13  ;;  %v2862_v53 = vsel %vm3683_vm4, %v2464_v18, %v2455_v16  ;;  %vm3707_vm6 = vcmp.eq.s32.totalorder %v2395_v54, %v2445_v13  ;;  %v1257_v54 = vld [vmem:[#allocation5 + $0x68] sm:$0xff] }
 0x121   : > { %v2834_v38 = vsel %vm3676_vm1, %v2464_v18, %v2457_v17  ;;  %vm2843_vm10 = vmand %vm3677_vm14, %vm2492_vm0  ;;  %vm3680_vm1 = vcmp.eq.s32.totalorder %v2436_v6, 1 }
 0x122   : > { %v2704_v61 = vpop.permute.xlu1 %823  ;;  %v2706_v2 = vpop.permute.xlu0 %820  ;;  %v3679_v42 = vsel %vm2843_vm10, 4294967295, %v3678_v42  ;;  %vm2853_vm15 = vmor %vm3680_vm1, %vm2730_vm3  ;;  %vm3686_vm3 = vcmp.eq.s32.totalorder %v2514_v26, %v2445_v13  ;;  %v1194_v26 = vld [vmem:[#allocation4 + $0x28] sm:$0xff] }
 0x123   : > { %3647 = vst [vmem:[#allocation27_spill] sm:$0xff] %v2704_v61  ;;  %3648 = vst [vmem:[#allocation28_spill] sm:$0xff] %v2706_v2  ;;  %v3682_v3 = vsel %vm2853_vm15, 4294967295, %v3681_v3  ;;  %v2876_v5 = vsel %vm3686_vm3, %v2464_v18, %v2455_v16  ;;  %vm3690_vm1 = vcmp.eq.s32.totalorder %v2704_v61, %v2445_v13 }
 0x124   : > { %vm3684_vm14 = vmmov %vm3683_vm4  ;;  %3687 = vst [vmem:[#allocation33_spill] sm:$0xff] %v2876_v5  ;;  %v2890_v58 = vsel %vm3690_vm1, %v2464_v18, %v2455_v16 }
 0x125   : > { %v2869_v7 = vsel %vm3684_vm14, %v2464_v18, %v2457_v17  ;;  %vm3688_vm4 = vmmov %vm3686_vm3  ;;  %3691 = vst [vmem:[#allocation35_spill] sm:$0xff] %v2890_v58  ;;  %vm3694_vm3 = vcmp.eq.s32.totalorder %v2706_v2, %v2445_v13 }
 0x126   : > { %3685 = vst [vmem:[#allocation32_spill] sm:$0xff] %v2869_v7  ;;  %v2883_v59 = vsel %vm3688_vm4, %v2464_v18, %v2457_v17  ;;  %vm3692_vm14 = vmmov %vm3690_vm1 }
 0x127   : > { %3689 = vst [vmem:[#allocation34_spill] sm:$0xff] %v2883_v59  ;;  %v2897_v5 = vsel %vm3692_vm14, %v2464_v18, %v2457_v17  ;;  %v2904_v59 = vsel %vm3694_vm3, %v2464_v18, %v2457_v17  ;;  %vm3563_vm4 = vmxor %vm2520_vm5, %vm2779_vm12  ;;  %vm3698_vm14 = vcmp.eq.s32.totalorder %v2436_v6, 1  ;;  %v3699_v17 = vmov 0 }
 0x128   : > { %3693 = vst [vmem:[#allocation36_spill] sm:$0xff] %v2897_v5  ;;  %3695 = vst [vmem:[#allocation37_spill] sm:$0xff] %v2904_v59  ;;  %vm3723_vm5 = vcmp.eq.s32.totalorder %v2428_v1, 1 }
 0x129   : > { %vm3696_vm1 = vmmov %vm3694_vm3 }
 0x12a   : > { %v2915_v5 = vsel %vm3696_vm1, %v2464_v18, %v2455_v16  ;;  %vm2921_vm3 = vmor %vm3698_vm14, %vm2550_vm9  ;;  %vm3701_vm9 = vcmp.eq.s32.totalorder %v2422_v63, %v2445_v13  ;;  %v3702_v18 = vmov 0  ;;  %v3705_v63 = vmov 0 }
 0x12b   : > { %3697 = vst [vmem:[#allocation38_spill] sm:$0xff] %v2915_v5  ;;  %v3700_v17 = vsel %vm2921_vm3, 4294967295, %v3699_v17  ;;  %vm3564_vm1 = vmxor %vm2659_vm2, %vm2804_vm13 }
 0x12c   : > { %vm2941_vm14 = vmand %vm3701_vm9, %vm2698_vm7  ;;  %vm3704_vm9 = vcmp.eq.s32.totalorder %v2436_v6, 1 }
 0x12d   : > { %v3703_v18 = vsel %vm2941_vm14, 4294967295, %v3702_v18  ;;  %vm2970_vm2 = vmand %vm3707_vm6, %vm2630_vm8 }
 0x12e   : > { %vm3711_vm6 = vmmov %vm3704_vm9 }
 0x183   : > { %v1735_v49 = vpop.f32.mrf.mxu0  ;;  %v1747_v58 = vpop.f32.mrf.mxu1 }
 0x184   : > { %v994_v59 = vmul.f32 %v1735_v49, %v960_v40  ;;  %v1202_v61 = vsel %vm2779_vm12, %v1735_v49, inf  ;;  %v1266_v2 = vsel %vm3563_vm4, %v1735_v49, -inf  ;;  %v1002_v16 = vmul.f32 %v1747_v58, %v968_v11  ;;  %vm2956_vm4 = vmor %vm3704_vm9, %vm2766_vm11 }
 0x185   : > { %v1218_v33 = vmin.f32 %v1186_v51, %v1202_v61  ;;  %v1282_v40 = vmax.f32 %v1250_v50, %v1266_v2  ;;  %v1210_v49 = vsel %vm2804_vm13, %v1747_v58, inf  ;;  %v1274_v11 = vsel %vm3564_vm1, %v1747_v58, -inf  ;;  %v678_v5 = vpop.f32.mrf.mxu0  ;;  %v718_v7 = vpop.f32.mrf.mxu1  ;;  %vm3566_vm1 = vmxor %vm2492_vm0, %vm2843_vm10 }
 0x186   : > { %v3706_v63 = vsel %vm2956_vm4, 4294967295, %v3705_v63  ;;  %v1010_v50 = vadd.f32 %v994_v59, %v2614_v41  ;;  %v1018_v51 = vadd.f32 %v1002_v16, %v986_v12  ;;  %v1226_v61 = vmin.f32 %v1194_v26, %v1210_v49  ;;  %v1193_v12 = vld [vmem:[#allocation4 + $0x40] sm:$0xff] }
 0x187   : > { %v1290_v2 = vmax.f32 %v1258_v46, %v1274_v11  ;;  %1234 = vst [vmem:[#allocation4] sm:$0xff] %v1218_v33  ;;  %1298 = vst [vmem:[#allocation5 + $0x38] sm:$0xff] %v1282_v40  ;;  %v993_v59 = vmul.f32 %v2571_v35, %v678_v5  ;;  %v1201_v26 = vsel %vm2843_vm10, %v678_v5, inf  ;;  %v1265_v41 = vsel %vm3566_vm1, %v678_v5, -inf  ;;  %v1738_v14 = vpop.f32.mrf.mxu0  ;;  %v1188_v11 = vld [vmem:[#allocation4 + $0x60] sm:$0xff] }
 0x188   : > { %v1001_v46 = vmul.f32 %v967_v15, %v718_v7  ;;  %vm3710_vm11 = vnez %v3639_v48  ;;  %v3712_v16 = vmov 0  ;;  %v1027_v35 = vmul.f32 1.442695, %v1010_v50  ;;  %1242 = vst [vmem:[#allocation4 + $0x28] sm:$0xff] %v1226_v61  ;;  %vm3573_vm1 = vmxor %vm2698_vm7, %vm2941_vm14  ;;  %v1750_v50 = vpop.f32.mrf.mxu1 }
 0x189   : > { %vm2986_vm9 = vmor %vm3711_vm6, %vm3710_vm11  ;;  %v1043_v33 = vmul.f32 1.442695, %v1018_v51  ;;  %1306 = vst [vmem:[#allocation5 + $0x60] sm:$0xff] %v1290_v2  ;;  %v1217_v40 = vmin.f32 %v1185_v27, %v1201_v26  ;;  %v1281_v49 = vmax.f32 %v1249_v19, %v1265_v41  ;;  %vm3714_vm0 = vnez %v3651_v4  ;;  %v1252_v51 = vld [vmem:[#allocation5 + $0x40] sm:$0xff]  ;;  %v688_v26 = vpop.f32.mrf.mxu0 }
 0x18a   : > { %v3713_v16 = vsel %vm2986_vm9, 4294967295, %v3712_v16  ;;  %vm3715_vm10 = vcmp.eq.s32.totalorder %v2440_v8, %v2445_v13  ;;  %v1009_v15 = vadd.f32 %v993_v59, %v2578_v36  ;;  %v1017_v5 = vadd.f32 %v1001_v46, %v2793_v22  ;;  %v1196_v59 = vld [vmem:[#allocation4 + $0x20] sm:$0xff]  ;;  %v1062_v8 = vld [vmem:[#allocation3 + $0x30] sm:$0xff] }
 0x18b   : > { %vm2999_vm11 = vmand %vm3715_vm10, %vm3714_vm0  ;;  %v1209_v27 = vsel %vm2941_vm14, %v718_v7, inf  ;;  %v1273_v19 = vsel %vm3573_vm1, %v718_v7, -inf  ;;  %vm3718_vm10 = vnez %v3658_v10  ;;  %vm3719_vm6 = vcmp.eq.s32.totalorder %v2388_v52, %v2445_v13  ;;  %1233 = vst [vmem:[#allocation4 + $0x8] sm:$0xff] %v1217_v40  ;;  %v1251_v40 = vld [vmem:[#allocation5 + $0x48] sm:$0xff] }
 0x18c   : > { %vm3017_vm13 = vmand %vm3719_vm6, %vm3718_vm10  ;;  %1890 = vpow2.f32 %v1027_v35  ;;  %1297 = vst [vmem:[#allocation5 + $0x18] sm:$0xff] %v1281_v49  ;;  %v1225_v36 = vmin.f32 %v1193_v12, %v1209_v27  ;;  %v1289_v22 = vmax.f32 %v1257_v54, %v1273_v19  ;;  %v996_v7 = vmul.f32 %v1738_v14, %v2585_v37  ;;  %v1260_v54 = vld [vmem:[#allocation5 + $0x30] sm:$0xff]  ;;  %v728_v49 = vpop.f32.mrf.mxu1 }
 0x18d   : > { %1892 = vpow2.f32 %v1043_v33  ;;  %v1025_v61 = vmul.f32 1.442695, %v1009_v15  ;;  %v1041_v2 = vmul.f32 1.442695, %v1017_v5  ;;  %vm3579_vm6 = vmxor %vm2630_vm8, %vm2970_vm2  ;;  %v1204_v52 = vsel %vm2970_vm2, %v1738_v14, inf  ;;  %v1187_v33 = vld [vmem:[#allocation4 + $0x48] sm:$0xff] }
 0x18e   : > { %vm3722_vm1 = vcmp.gt.s32.totalorder %v2424_v0, %v2526_v28  ;;  %1241 = vst [vmem:[#allocation4 + $0x40] sm:$0xff] %v1225_v36  ;;  %1305 = vst [vmem:[#allocation5 + $0x68] sm:$0xff] %v1289_v22  ;;  %v1012_v41 = vadd.f32 %v996_v7, %v2602_v39  ;;  %v1220_v46 = vmin.f32 %v1188_v11, %v1204_v52  ;;  %v1268_v12 = vsel %vm3579_vm6, %v1738_v14, -inf  ;;  %v1195_v36 = vld [vmem:[#allocation4 + $0x70] sm:$0xff]  ;;  %v1259_v22 = vld [vmem:[#allocation5 + $0x78] sm:$0xff] }
 0x18f   : > { %vm3035_vm7 = vmand %vm3723_vm5, %vm3722_vm1  ;;  %v1004_v28 = vmul.f32 %v1750_v50, %v2813_v24  ;;  %vm3726_vm5 = vcmp.gt.s32.totalorder %v2424_v0, %v2475_v20  ;;  %vm3727_vm1 = vcmp.eq.s32.totalorder %v2428_v1, 1  ;;  %vm3730_vm6 = vcmp.eq.s32.totalorder %v2442_v9, %v2445_v13  ;;  %v1189_v39 = vld [vmem:[#allocation4 + $0x68] sm:$0xff] }
 0x190   : > { %vm3581_vm14 = vmxor %vm3714_vm0, %vm2999_vm11  ;;  %1894 = vpow2.f32 %v1025_v61  ;;  %v1284_v24 = vmax.f32 %v1252_v51, %v1268_v12  ;;  %v1212_v20 = vsel %vm2999_vm11, %v1750_v50, inf  ;;  %v1031_v9 = vmul.f32 1.442695, %v1012_v41  ;;  %1236 = vst [vmem:[#allocation4 + $0x60] sm:$0xff] %v1220_v46  ;;  %v1190_v41 = vld [vmem:[#allocation4 + $0x18] sm:$0xff]  ;;  %v1753_v46 = vpop.f32.mrf.mxu1  ;;  %v1070_v14 = vld [vmem:[#allocation3 + $0x8] sm:$0xff] }
 0x191   : > { %vm3055_vm12 = vmand %vm3727_vm1, %vm3726_vm5  ;;  %v1276_v35 = vsel %vm3581_vm14, %v1750_v50, -inf  ;;  %1896 = vpow2.f32 %v1041_v2  ;;  %v1020_v15 = vadd.f32 %v1004_v28, %v2820_v34  ;;  %v1228_v5 = vmin.f32 %v1196_v59, %v1212_v20 }
 0x192   : > { %vm3064_vm8 = vmand %vm3730_vm6, %vm2853_vm15  ;;  %vm3733_vm5 = vcmp.eq.s32.totalorder %v2400_v56, %v2445_v13  ;;  %v3734_v27 = vmov 0  ;;  %1300 = vst [vmem:[#allocation5 + $0x40] sm:$0xff] %v1284_v24  ;;  %v1292_v19 = vmax.f32 %v1260_v54, %v1276_v35  ;;  %v995_v11 = vmul.f32 %v2537_v31, %v688_v26  ;;  %v1741_v56 = vpop.f32.mrf.mxu0  ;;  %v1198_v35 = vld [vmem:[#allocation4 + $0x30] sm:$0xff] }
 0x193   : > { %vm3582_vm6 = vmxor %vm3718_vm10, %vm3017_vm13  ;;  %v1203_v34 = vsel %vm3017_vm13, %v688_v26, inf  ;;  %1898 = vpow2.f32 %v1031_v9  ;;  %v1047_v7 = vmul.f32 1.442695, %v1020_v15  ;;  %1244 = vst [vmem:[#allocation4 + $0x20] sm:$0xff] %v1228_v5  ;;  %v3737_v61 = vmov 0 }
 0x194   : > { %vm3085_vm1 = vmand %vm3733_vm5, %vm2921_vm3  ;;  %v1267_v50 = vsel %vm3582_vm6, %v688_v26, -inf  ;;  %v1219_v51 = vmin.f32 %v1187_v33, %v1203_v34  ;;  %vm3736_vm6 = vcmp.eq.s32.totalorder %v2512_v25, %v2445_v13  ;;  %1308 = vst [vmem:[#allocation5 + $0x30] sm:$0xff] %v1292_v19  ;;  %v1011_v2 = vadd.f32 %v995_v11, %v2544_v32  ;;  %v1254_v25 = vld [vmem:[#allocation5] sm:$0xff]  ;;  %v698_v9 = vpop.f32.mrf.mxu0  ;;  %v1058_v19 = vld [vmem:[#allocation3 + $0x68] sm:$0xff] }
 0x195   : > { %v3735_v27 = vsel %vm3085_vm1, 4294967295, %v3734_v27  ;;  %v1283_v31 = vmax.f32 %v1251_v40, %v1267_v50  ;;  %vm3584_vm14 = vmxor %vm2853_vm15, %vm3064_vm8  ;;  %v1003_v52 = vmul.f32 %v2827_v62, %v728_v49  ;;  %v1211_v59 = vsel %vm3064_vm8, %v728_v49, inf  ;;  %v1262_v33 = vld [vmem:[#allocation5 + $0x20] sm:$0xff]  ;;  %v3746_v34 = vld [vmem:[#allocation32_spill] sm:$0xff] }
 0x196   : > { %vm3108_vm10 = vmand %vm3736_vm6, %vm2956_vm4  ;;  %v1275_v26 = vsel %vm3584_vm14, %v728_v49, -inf  ;;  %1900 = vpow2.f32 %v1047_v7  ;;  %1235 = vst [vmem:[#allocation4 + $0x48] sm:$0xff] %v1219_v51  ;;  %v1227_v12 = vmin.f32 %v1195_v36, %v1211_v59  ;;  %v998_v32 = vmul.f32 %v1741_v56, %v2639_v44  ;;  %v1122_v11 = vld [vmem:[#allocation2] sm:$0xff]  ;;  %v1066_v51 = vld [vmem:[#allocation3 + $0x78] sm:$0xff] }
 0x197   : > { %v3738_v61 = vsel %vm3108_vm10, 4294967295, %v3737_v61  ;;  %1299 = vst [vmem:[#allocation5 + $0x48] sm:$0xff] %v1283_v31  ;;  %v1291_v28 = vmax.f32 %v1259_v22, %v1275_v26  ;;  %vm3586_vm6 = vmxor %vm2921_vm3, %vm3085_vm1  ;;  %vm3739_vm14 = vcmp.eq.s32.totalorder %v2402_v57, %v2445_v13  ;;  %v3740_v62 = vmov 0  ;;  %v1130_v31 = vld [vmem:[#allocation2 + $0x20] sm:$0xff] }
 0x198   : > { %vm3131_vm5 = vmand %vm3739_vm14, %vm2986_vm9  ;;  %v1029_v54 = vmul.f32 1.442695, %v1011_v2  ;;  %v1019_v24 = vadd.f32 %v1003_v52, %v2834_v38  ;;  %v1206_v20 = vsel %vm3085_vm1, %v1741_v56, inf  ;;  %v1270_v44 = vsel %vm3586_vm6, %v1741_v56, -inf  ;;  %1243 = vst [vmem:[#allocation4 + $0x70] sm:$0xff] %v1227_v12  ;;  %v3750_v2 = vld [vmem:[#allocation23_spill] sm:$0xff] }
 0x199   : > { %v3741_v62 = vsel %vm3131_vm5, 4294967295, %v3740_v62  ;;  %1307 = vst [vmem:[#allocation5 + $0x78] sm:$0xff] %v1291_v28  ;;  %v1014_v57 = vadd.f32 %v998_v32, %v2646_v45  ;;  %v1222_v40 = vmin.f32 %v1190_v41, %v1206_v20  ;;  %v1286_v38 = vmax.f32 %v1254_v25, %v1270_v44  ;;  %vm3588_vm15 = vmxor %vm2956_vm4, %vm3108_vm10  ;;  %v1891_v56 = vpop.eup %1890  ;;  %v3754_v25 = vld [vmem:[#allocation31_spill] sm:$0xff]  ;;  %v3756_v12 = vld [vmem:[#allocation22_spill] sm:$0xff] }
 0x19a   : > { %v1006_v49 = vmul.f32 %v1753_v46, %v2862_v53  ;;  %vm3742_vm6 = vcmp.gt.s32.totalorder %v2424_v0, %v2477_v21  ;;  %vm3743_vm3 = vcmp.eq.s32.totalorder %v2428_v1, 1  ;;  %1902 = vpow2.f32 %v1029_v54  ;;  %v1893_v26 = vpop.eup %1892  ;;  %v1253_v54 = vld [vmem:[#allocation5 + $0x28] sm:$0xff] }
 0x19b   : > { %vm3156_vm14 = vmand %vm3743_vm3, %vm3742_vm6  ;;  %v1045_v45 = vmul.f32 1.442695, %v1019_v24  ;;  %v1214_v5 = vsel %vm3108_vm10, %v1753_v46, inf  ;;  %v1278_v53 = vsel %vm3588_vm15, %v1753_v46, -inf  ;;  %v1035_v21 = vmul.f32 1.442695, %v1014_v57 }
 0x19c   : > { %1238 = vst [vmem:[#allocation4 + $0x18] sm:$0xff] %v1222_v40  ;;  %1302 = vst [vmem:[#allocation5] sm:$0xff] %v1286_v38  ;;  %v1022_v50 = vadd.f32 %v1006_v49, %v3746_v34  ;;  %v1230_v36 = vmin.f32 %v1198_v35, %v1214_v5  ;;  %v1294_v22 = vmax.f32 %v1262_v33, %v1278_v53  ;;  %vm3747_vm6 = vcmp.eq.s32.totalorder %v2436_v6, 1  ;;  %v1057_v57 = vld [vmem:[#allocation3 + $0x28] sm:$0xff]  ;;  %v1121_v40 = vld [vmem:[#allocation2 + $0x30] sm:$0xff] }
 0x19d   : > { %vm3594_vm3 = vmxor %vm2986_vm9, %vm3131_vm5  ;;  %1904 = vpow2.f32 %v1045_v45  ;;  %v997_v52 = vmul.f32 %v3750_v2, %v698_v9  ;;  %v1205_v59 = vsel %vm3131_vm5, %v698_v9, inf  ;;  %vm3755_vm4 = vnez %v3754_v25  ;;  %v1895_v38 = vpop.eup %1894  ;;  %v3765_v49 = vld [vmem:[#allocation21_spill] sm:$0xff]  ;;  %v1065_v5 = vld [vmem:[#allocation3 + $0x20] sm:$0xff] }
 0x19e   : > { %vm3176_vm15 = vmor %vm3747_vm6, %vm3035_vm7  ;;  %v1269_v37 = vsel %vm3594_vm3, %v698_v9, -inf  ;;  %v1074_v46 = vsel %vm3755_vm4, %v1891_v56, 0.0  ;;  %vm3757_vm10 = vnez %v3756_v12  ;;  %1906 = vpow2.f32 %v1035_v21  ;;  %1246 = vst [vmem:[#allocation4 + $0x30] sm:$0xff] %v1230_v36  ;;  %v1060_v2 = vld [vmem:[#allocation3 + $0x40] sm:$0xff]  ;;  %v3800_v21 = vld [vmem:[#allocation25_spill] sm:$0xff] }
 0x19f   : > { %vm3751_vm7 = vmmov %vm3747_vm6  ;;  %v1051_v32 = vmul.f32 1.442695, %v1022_v50  ;;  %1310 = vst [vmem:[#allocation5 + $0x20] sm:$0xff] %v1294_v22  ;;  %v1090_v20 = vadd.f32 %v1074_v46, %v1058_v19  ;;  %vm3762_vm3 = vnez %v3672_v55  ;;  %v3769_v55 = vld [vmem:[#allocation24_spill] sm:$0xff]  ;;  %v738_v19 = vpop.f32.mrf.mxu1  ;;  %v1221_v36 = vmin.f32 %v1189_v39, %v1205_v59  ;;  %v3784_v46 = vld [vmem:[#allocation33_spill] sm:$0xff] }
 0x1a0   : > { %vm3192_vm6 = vmor %vm3751_vm7, %vm3055_vm12  ;;  %v1082_v35 = vsel %vm3762_vm3, %v1893_v26, 0.0  ;;  %v1013_v53 = vadd.f32 %v997_v52, %v3769_v55  ;;  %v1285_v22 = vmax.f32 %v1253_v54, %v1269_v37  ;;  %vm3781_vm5 = vnez %v3703_v18  ;;  %v1124_v52 = vld [vmem:[#allocation2 + $0x18] sm:$0xff]  ;;  %v3796_v55 = vld [vmem:[#allocation27_spill] sm:$0xff] }
 0x1a1   : > { %vm3758_vm1 = vmxor %vm3757_vm10, %vm3755_vm4  ;;  %vm3763_vm4 = vnez %v3636_v47  ;;  %v1098_v15 = vadd.f32 %v1082_v35, %v1066_v51  ;;  %v1129_v47 = vld [vmem:[#allocation2 + $0x40] sm:$0xff]  ;;  %1908 = vpow2.f32 %v1051_v32  ;;  %1106 = vst [vmem:[#allocation3 + $0x68] sm:$0xff] %v1090_v20  ;;  %v1005_v12 = vmul.f32 %v3784_v46, %v738_v19  ;;  %v1068_v54 = vld [vmem:[#allocation3 + $0x58] sm:$0xff] }
 0x1a2   : > { %v1138_v28 = vsel %vm3758_vm1, %v1891_v56, 0.0  ;;  %vm3759_vm12 = vmmov %vm3751_vm7  ;;  %vm3766_vm1 = vcmp.eq.s32.totalorder %v3765_v49, %v2445_v13  ;;  %v1033_v25 = vmul.f32 1.442695, %v1013_v53  ;;  %1237 = vst [vmem:[#allocation4 + $0x68] sm:$0xff] %v1221_v36  ;;  %v1132_v20 = vld [vmem:[#allocation2 + $0x38] sm:$0xff]  ;;  %v3808_v46 = vld [vmem:[#allocation20_spill] sm:$0xff] }
 0x1a3   : > { %vm3207_vm7 = vmor %vm3759_vm12, %vm3156_vm14  ;;  %v1154_v44 = vadd.f32 %v1138_v28, %v1122_v11  ;;  %v1897_v11 = vpop.eup %1896  ;;  %vm3771_vm12 = vcmp.eq.s32.totalorder %v2428_v1, 1  ;;  %1114 = vst [vmem:[#allocation3 + $0x78] sm:$0xff] %v1098_v15  ;;  %v1261_v28 = vld [vmem:[#allocation5 + $0x50] sm:$0xff]  ;;  %v3297_v15 = vpop.f32.mrf.mxu1 }
 0x1a4   : > { %vm3764_vm10 = vmxor %vm3763_vm4, %vm3762_vm3  ;;  %vm3770_vm3 = vcmp.gt.s32.totalorder %v2424_v0, %v2528_v29  ;;  %v3777_v29 = vld [vmem:[#allocation19_spill] sm:$0xff]  ;;  %v1899_v59 = vpop.eup %1898  ;;  %1301 = vst [vmem:[#allocation5 + $0x28] sm:$0xff] %v1285_v22  ;;  %1910 = vpow2.f32 %v1033_v25  ;;  %v1072_v9 = vld [vmem:[#allocation3 + $0x50] sm:$0xff] }
 0x1a5   : > { %v1146_v33 = vsel %vm3764_vm10, %v1893_v26, 0.0  ;;  %vm3223_vm14 = vmand %vm3766_vm1, %vm3176_vm15  ;;  %1170 = vst [vmem:[#allocation2] sm:$0xff] %v1154_v44  ;;  %vm3774_vm10 = vnez %v3679_v42  ;;  %vm3775_vm1 = vnez %v3616_v23  ;;  %v1081_v23 = vsel %vm3781_vm5, %v1897_v11, 0.0 }
 0x1a6   : > { %v1162_v45 = vadd.f32 %v1146_v33, %v1130_v31  ;;  %vm3233_vm4 = vmand %vm3771_vm12, %vm3770_vm3  ;;  %v1073_v34 = vsel %vm3774_vm10, %v1895_v38, 0.0  ;;  %vm3778_vm3 = vcmp.eq.s32.totalorder %v3777_v29, %v2445_v13  ;;  %v1097_v37 = vadd.f32 %v1081_v23, %v1065_v5  ;;  %v1744_v33 = vpop.f32.mrf.mxu0 }
 0x1a7   : > { %vm3776_vm9 = vmxor %vm3775_vm1, %vm3774_vm10  ;;  %v1089_v51 = vadd.f32 %v1073_v34, %v1057_v57  ;;  %v1076_v32 = vsel %vm2970_vm2, %v1899_v59, 0.0  ;;  %v1213_v44 = vsel %vm3223_vm14, %v738_v19, inf  ;;  %v1901_v57 = vpop.eup %1900  ;;  %v1000_v34 = vmul.f32 %v1744_v33, %v3800_v21  ;;  %v1255_v21 = vld [vmem:[#allocation5 + $0x8] sm:$0xff] }
 0x1a8   : > { %v1137_v50 = vsel %vm3776_vm9, %v1895_v38, 0.0  ;;  %vm3249_vm12 = vmand %vm3778_vm3, %vm3192_vm6  ;;  %1178 = vst [vmem:[#allocation2 + $0x20] sm:$0xff] %v1162_v45  ;;  %vm3782_vm9 = vnez %v3646_v60  ;;  %v1197_v60 = vld [vmem:[#allocation4 + $0x58] sm:$0xff]  ;;  %v1092_v58 = vadd.f32 %v1076_v32, %v1060_v2  ;;  %v1084_v45 = vsel %vm2999_vm11, %v1901_v57, 0.0  ;;  %v1903_v36 = vpop.eup %1902 }
 0x1a9   : > { %v1153_v31 = vadd.f32 %v1137_v50, %v1121_v40  ;;  %vm3783_vm10 = vmxor %vm3782_vm9, %vm3781_vm5  ;;  %vm3785_vm5 = vcmp.eq.s32.totalorder %v2436_v6, 1  ;;  %1105 = vst [vmem:[#allocation3 + $0x28] sm:$0xff] %v1089_v51  ;;  %vm3788_vm9 = vnez %v3633_v43  ;;  %v3794_v38 = vld [vmem:[#allocation34_spill] sm:$0xff]  ;;  %v1100_v48 = vadd.f32 %v1084_v45, %v1068_v54  ;;  %v1256_v50 = vld [vmem:[#allocation5 + $0x70] sm:$0xff] }
 0x1aa   : > { %v1145_v42 = vsel %vm3783_vm10, %v1897_v11, 0.0  ;;  %vm3599_vm1 = vmxor %vm3176_vm15, %vm3223_vm14  ;;  %1113 = vst [vmem:[#allocation3 + $0x20] sm:$0xff] %v1097_v37  ;;  %v1021_v49 = vadd.f32 %v1005_v12, %v3794_v38  ;;  %v1208_v29 = vsel %vm3249_vm12, %v1744_v33, inf  ;;  %v3807_v37 = vld [vmem:[#allocation26_spill] sm:$0xff]  ;;  %v1905_v25 = vpop.eup %1904  ;;  %v3818_v43 = vld [vmem:[#allocation36_spill] sm:$0xff] }
 0x1ab   : > { %v1161_v26 = vadd.f32 %v1145_v42, %v1129_v47  ;;  %vm3269_vm3 = vmor %vm3785_vm5, %vm3233_vm4  ;;  %1169 = vst [vmem:[#allocation2 + $0x30] sm:$0xff] %v1153_v31  ;;  %v1277_v35 = vsel %vm3599_vm1, %v738_v19, -inf  ;;  %vm3790_vm4 = vcmp.gt.s32.totalorder %v2424_v0, %v2530_v30  ;;  %vm3791_vm5 = vcmp.eq.s32.totalorder %v2428_v1, 1  ;;  %v1059_v1 = vld [vmem:[#allocation3 + $0x10] sm:$0xff]  ;;  %v1192_v47 = vld [vmem:[#allocation4 + $0x38] sm:$0xff]  ;;  %v1907_v54 = vpop.eup %1906 }
 0x1ac   : > { %vm3789_vm10 = vmxor %vm3788_vm9, %vm2970_vm2  ;;  %v1229_v30 = vmin.f32 %v1197_v60, %v1213_v44  ;;  %v1293_v5 = vmax.f32 %v1261_v28, %v1277_v35  ;;  %1108 = vst [vmem:[#allocation3 + $0x40] sm:$0xff] %v1092_v58  ;;  %v1123_v19 = vld [vmem:[#allocation2 + $0x58] sm:$0xff]  ;;  %v1049_v11 = vmul.f32 1.442695, %v1021_v49  ;;  %v3804_v31 = vld [vmem:[#allocation35_spill] sm:$0xff]  ;;  %v1075_v42 = vsel %vm3017_vm13, %v1903_v36, 0.0 }
 0x1ad   : > { %v1140_v39 = vsel %vm3789_vm10, %v1899_v59, 0.0  ;;  %vm3292_vm2 = vmand %vm3791_vm5, %vm3790_vm4  ;;  %1177 = vst [vmem:[#allocation2 + $0x40] sm:$0xff] %v1161_v26  ;;  %vm3797_vm4 = vcmp.eq.s32.totalorder %v3796_v55, %v2445_v13  ;;  %v1008_v23 = vmul.f32 %v3297_v15, %v3804_v31  ;;  %v1131_v59 = vld [vmem:[#allocation2 + $0x10] sm:$0xff]  ;;  %v1016_v26 = vadd.f32 %v1000_v34, %v3807_v37  ;;  %v1126_v28 = vld [vmem:[#allocation2 + $0x68] sm:$0xff]  ;;  %v748_v55 = vpop.f32.mrf.mxu1 }
 0x1ae   : > { %v1156_v40 = vadd.f32 %v1140_v39, %v1124_v52  ;;  %vm3795_vm9 = vmxor %vm3714_vm0, %vm2999_vm11  ;;  %vm3801_vm0 = vcmp.eq.s32.totalorder %v2436_v6, 1  ;;  %1245 = vst [vmem:[#allocation4 + $0x58] sm:$0xff] %v1229_v30  ;;  %v1067_v52 = vld [vmem:[#allocation3 + $0x18] sm:$0xff]  ;;  %1912 = vpow2.f32 %v1049_v11  ;;  %v1224_v32 = vmin.f32 %v1192_v47, %v1208_v29  ;;  %v1134_v45 = vld [vmem:[#allocation2 + $0x70] sm:$0xff] }
 0x1af   : > { %v1148_v0 = vsel %vm3795_vm9, %v1901_v57, 0.0  ;;  %vm3598_vm10 = vmxor %vm3192_vm6, %vm3249_vm12  ;;  %1309 = vst [vmem:[#allocation5 + $0x50] sm:$0xff] %v1293_v5  ;;  %v1083_v35 = vsel %vm3064_vm8, %v1905_v25, 0.0  ;;  %v1039_v57 = vmul.f32 1.442695, %v1016_v26  ;;  %v1024_v58 = vadd.f32 %v1008_v23, %v3818_v43  ;;  %v1191_v11 = vld [vmem:[#allocation4 + $0x10] sm:$0xff] }
 0x1b0   : > { %vm3315_vm5 = vmand %vm3797_vm4, %vm3269_vm3  ;;  %1172 = vst [vmem:[#allocation2 + $0x18] sm:$0xff] %v1156_v40  ;;  %v1164_v53 = vadd.f32 %v1148_v0, %v1132_v20  ;;  %v1272_v51 = vsel %vm3598_vm10, %v1744_v33, -inf  ;;  %vm3809_vm4 = vcmp.eq.s32.totalorder %v3808_v46, %v2445_v13  ;;  %v3812_v20 = vld [vmem:[#allocation28_spill] sm:$0xff]  ;;  %v1200_v40 = vld [vmem:[#allocation4 + $0x78] sm:$0xff]  ;;  %vm3820_vm10 = vnez %v3700_v17  ;;  %v708_v17 = vpop.f32.mrf.mxu0 }
 0x1b1   : > { %vm3324_vm11 = vmor %vm3801_vm0, %vm3292_vm2  ;;  %v1216_v6 = vsel %vm3315_vm5, %v3297_v15, inf  ;;  %1116 = vst [vmem:[#allocation3 + $0x58] sm:$0xff] %v1100_v48  ;;  %vm3805_vm2 = vnez %v3658_v10  ;;  %v1091_v10 = vadd.f32 %v1075_v42, %v1059_v1  ;;  %v1288_v39 = vmax.f32 %v1256_v50, %v1272_v51  ;;  %v1264_v0 = vld [vmem:[#allocation5 + $0x10] sm:$0xff]  ;;  %v1909_v1 = vpop.eup %1908  ;;  %v3825_v29 = vld [vmem:[#allocation30_spill] sm:$0xff] }
 0x1b2   : > { %1180 = vst [vmem:[#allocation2 + $0x38] sm:$0xff] %v1164_v53  ;;  %vm3806_vm9 = vmxor %vm3805_vm2, %vm3017_vm13  ;;  %vm3813_vm13 = vcmp.eq.s32.totalorder %v3812_v20, %v2445_v13  ;;  %v1099_v13 = vadd.f32 %v1083_v35, %v1067_v52  ;;  %1914 = vpow2.f32 %v1039_v57  ;;  %v1055_v47 = vmul.f32 1.442695, %v1024_v58  ;;  %v3826_v23 = vld [vmem:[#allocation38_spill] sm:$0xff]  ;;  %v1061_v42 = vld [vmem:[#allocation3 + $0x48] sm:$0xff] }
 0x1b3   : > { %v1139_v2 = vsel %vm3806_vm9, %v1903_v36, 0.0  ;;  %vm3353_vm0 = vmand %vm3809_vm4, %vm3207_vm7  ;;  %vm3816_vm9 = vnez %v3682_v3  ;;  %1107 = vst [vmem:[#allocation3 + $0x10] sm:$0xff] %v1091_v10  ;;  %v1232_v53 = vmin.f32 %v1200_v40, %v1216_v6  ;;  %v1263_v36 = vld [vmem:[#allocation5 + $0x58] sm:$0xff]  ;;  %v999_v51 = vmul.f32 %v3825_v29, %v708_v17  ;;  %v3827_v46 = vld [vmem:[#allocation29_spill] sm:$0xff] }
 0x1b4   : > { %v1155_v60 = vadd.f32 %v1139_v2, %v1123_v19  ;;  %vm3362_vm2 = vmand %vm3813_vm13, %vm3324_vm11  ;;  %vm3819_vm13 = vnez %v3735_v27  ;;  %1240 = vst [vmem:[#allocation4 + $0x38] sm:$0xff] %v1224_v32  ;;  %1916 = vpow2.f32 %v1055_v47  ;;  %v1007_v6 = vmul.f32 %v3826_v23, %v748_v55  ;;  %v1125_v2 = vld [vmem:[#allocation2 + $0x50] sm:$0xff]  ;;  %v1069_v43 = vld [vmem:[#allocation3] sm:$0xff] }
 0x1b5   : > { %vm3817_vm4 = vmxor %vm3816_vm9, %vm3064_vm8  ;;  %v1078_v49 = vsel %vm3819_vm13, %v1907_v54, 0.0  ;;  %1304 = vst [vmem:[#allocation5 + $0x70] sm:$0xff] %v1288_v39  ;;  %v1215_v37 = vsel %vm3362_vm2, %v748_v55, inf  ;;  %v1015_v10 = vadd.f32 %v999_v51, %v3827_v46  ;;  %v1133_v58 = vld [vmem:[#allocation2 + $0x60] sm:$0xff] }
 0x1b6   : > { %v1147_v33 = vsel %vm3817_vm4, %v1905_v25, 0.0  ;;  %1171 = vst [vmem:[#allocation2 + $0x58] sm:$0xff] %v1155_v60  ;;  %vm3821_vm1 = vmxor %vm3820_vm10, %vm3819_vm13  ;;  %v1094_v30 = vadd.f32 %v1078_v49, %v1062_v8  ;;  %vm3823_vm10 = vnez %v3706_v63  ;;  %v1911_v25 = vpop.eup %1910  ;;  %v3828_v60 = vld [vmem:[#allocation37_spill] sm:$0xff]  ;;  %v1064_v49 = vld [vmem:[#allocation3 + $0x38] sm:$0xff] }
 0x1b7   : > { %v1163_v38 = vadd.f32 %v1147_v33, %v1131_v59  ;;  %v1142_v3 = vsel %vm3821_vm1, %v1907_v54, 0.0  ;;  %vm955_vm8 = vmxor %vm3269_vm3, %vm3315_vm5  ;;  %1115 = vst [vmem:[#allocation3 + $0x18] sm:$0xff] %v1099_v13  ;;  %vm3822_vm1 = vnez %v3738_v61  ;;  %v1199_v61 = vld [vmem:[#allocation4 + $0x50] sm:$0xff]  ;;  %v1023_v8 = vadd.f32 %v1007_v6, %v3828_v60 }
 0x1b8   : > { %v1158_v5 = vadd.f32 %v1142_v3, %v1126_v28  ;;  %v1086_v27 = vsel %vm3822_vm1, %v1909_v1, 0.0  ;;  %vm3824_vm9 = vmxor %vm3823_vm10, %vm3822_vm1  ;;  %v1280_v19 = vsel %vm955_vm8, %v3297_v15, -inf  ;;  %1110 = vst [vmem:[#allocation3 + $0x30] sm:$0xff] %v1094_v30  ;;  %v1207_v15 = vsel %vm3353_vm0, %v708_v17, inf  ;;  %v1128_v3 = vld [vmem:[#allocation2 + $0x48] sm:$0xff] }
 0x1b9   : > { %1179 = vst [vmem:[#allocation2 + $0x10] sm:$0xff] %v1163_v38  ;;  %v1150_v48 = vsel %vm3824_vm9, %v1909_v1, 0.0  ;;  %v1102_v34 = vadd.f32 %v1086_v27, %v1070_v14  ;;  %v1296_v63 = vmax.f32 %v1264_v0, %v1280_v19  ;;  %vm946_vm4 = vmxor %vm3207_vm7, %vm3353_vm0  ;;  %v1223_v52 = vmin.f32 %v1191_v11, %v1207_v15  ;;  %v1136_v0 = vld [vmem:[#allocation2 + $0x28] sm:$0xff]  ;;  %v1135_v19 = vld [vmem:[#allocation2 + $0x78] sm:$0xff] }
 0x1ba   : > { %1174 = vst [vmem:[#allocation2 + $0x68] sm:$0xff] %v1158_v5  ;;  %v1166_v50 = vadd.f32 %v1150_v48, %v1134_v45  ;;  %1248 = vst [vmem:[#allocation4 + $0x78] sm:$0xff] %v1232_v53  ;;  %v1271_v31 = vsel %vm946_vm4, %v708_v17, -inf  ;;  %v1231_v28 = vmin.f32 %v1199_v61, %v1215_v37  ;;  %vm3829_vm1 = vnez %v3741_v62  ;;  %v1127_v27 = vld [vmem:[#allocation2 + $0x8] sm:$0xff]  ;;  %v1071_v53 = vld [vmem:[#allocation3 + $0x60] sm:$0xff] }
 0x1bb   : > { %vm954_vm13 = vmxor %vm3324_vm11, %vm3362_vm2  ;;  %1118 = vst [vmem:[#allocation3 + $0x8] sm:$0xff] %v1102_v34  ;;  %v1287_v59 = vmax.f32 %v1255_v21, %v1271_v31  ;;  %v1077_v39 = vsel %vm3829_vm1, %v1911_v25, 0.0  ;;  %vm3830_vm10 = vnez %v3713_v16  ;;  %v1037_v33 = vmul.f32 1.442695, %v1015_v10  ;;  %v1913_v40 = vpop.eup %1912 }
 0x1bc   : > { %1182 = vst [vmem:[#allocation2 + $0x70] sm:$0xff] %v1166_v50  ;;  %1312 = vst [vmem:[#allocation5 + $0x10] sm:$0xff] %v1296_v63  ;;  %v1279_v26 = vsel %vm954_vm13, %v748_v55, -inf  ;;  %v1093_v20 = vadd.f32 %v1077_v39, %v1061_v42  ;;  %v1053_v57 = vmul.f32 1.442695, %v1023_v8  ;;  %v1085_v16 = vsel %vm3223_vm14, %v1913_v40, 0.0 }
 0x1bd   : > { %v1295_v32 = vmax.f32 %v1263_v36, %v1279_v26  ;;  %vm3831_vm9 = vmxor %vm3830_vm10, %vm3829_vm1  ;;  %1239 = vst [vmem:[#allocation4 + $0x10] sm:$0xff] %v1223_v52  ;;  %1918 = vpow2.f32 %v1037_v33  ;;  %v1101_v13 = vadd.f32 %v1085_v16, %v1069_v43  ;;  %v1063_v55 = vld [vmem:[#allocation3 + $0x70] sm:$0xff] }
 0x1be   : > { %v1141_v54 = vsel %vm3831_vm9, %v1911_v25, 0.0  ;;  %1303 = vst [vmem:[#allocation5 + $0x8] sm:$0xff] %v1287_v59  ;;  %1247 = vst [vmem:[#allocation4 + $0x50] sm:$0xff] %v1231_v28  ;;  %1920 = vpow2.f32 %v1053_v57 }
 0x1bf   : > { %v1157_v35 = vadd.f32 %v1141_v54, %v1125_v2  ;;  %1311 = vst [vmem:[#allocation5 + $0x58] sm:$0xff] %v1295_v32  ;;  %1109 = vst [vmem:[#allocation3 + $0x48] sm:$0xff] %v1093_v20  ;;  %v1915_v14 = vpop.eup %1914 }
 0x1c0   : > { %vm3832_vm1 = vmxor %vm3176_vm15, %vm3223_vm14  ;;  %1117 = vst [vmem:[#allocation3] sm:$0xff] %v1101_v13  ;;  %v1080_v45 = vsel %vm3249_vm12, %v1915_v14, 0.0 }
 0x1c1   : > { %1173 = vst [vmem:[#allocation2 + $0x50] sm:$0xff] %v1157_v35  ;;  %v1149_v62 = vsel %vm3832_vm1, %v1913_v40, 0.0  ;;  %vm3833_vm10 = vmxor %vm3192_vm6, %vm3249_vm12  ;;  %v1917_v1 = vpop.eup %1916  ;;  %v1096_v30 = vadd.f32 %v1080_v45, %v1064_v49 }
 0x1c2   : > { %v1165_v38 = vadd.f32 %v1149_v62, %v1133_v58  ;;  %v1144_v7 = vsel %vm3833_vm10, %v1915_v14, 0.0  ;;  %v1088_v47 = vsel %vm3315_vm5, %v1917_v1, 0.0  ;;  %v1152_v17 = vsel %vm955_vm8, %v1917_v1, 0.0 }
 0x1c3   : > { %v1160_v5 = vadd.f32 %v1144_v7, %v1128_v3  ;;  %1112 = vst [vmem:[#allocation3 + $0x38] sm:$0xff] %v1096_v30  ;;  %v1104_v41 = vadd.f32 %v1088_v47, %v1072_v9  ;;  %v1168_v56 = vadd.f32 %v1152_v17, %v1136_v0 }
 0x1c4   : > { %1181 = vst [vmem:[#allocation2 + $0x60] sm:$0xff] %v1165_v38 }
 0x1c5   : > { %1176 = vst [vmem:[#allocation2 + $0x48] sm:$0xff] %v1160_v5  ;;  %1120 = vst [vmem:[#allocation3 + $0x50] sm:$0xff] %v1104_v41 }
 0x1c6   : > { %1184 = vst [vmem:[#allocation2 + $0x28] sm:$0xff] %v1168_v56 }
 0x1ca   : > { %v1919_v48 = vpop.eup %1918 }
 0x1cb   : > { %v1921_v11 = vpop.eup %1920  ;;  %v1079_v21 = vsel %vm3353_vm0, %v1919_v48, 0.0  ;;  %v1143_v18 = vsel %vm946_vm4, %v1919_v48, 0.0  ;;  %1316 = sbr.rel (%p1659_p5) target bundleno = 715 (0x2cb), region = 52 }
 0x1cc   : > { %v1095_v4 = vadd.f32 %v1079_v21, %v1063_v55  ;;  %v1159_v34 = vadd.f32 %v1143_v18, %v1127_v27  ;;  %v1087_v50 = vsel %vm3362_vm2, %v1921_v11, 0.0  ;;  %v1151_v63 = vsel %vm954_vm13, %v1921_v11, 0.0 }
 0x1cd   : > { %v1103_v61 = vadd.f32 %v1087_v50, %v1071_v53  ;;  %v1167_v36 = vadd.f32 %v1151_v63, %v1135_v19 }
 0x1ce   : > { %1111 = vst [vmem:[#allocation3 + $0x70] sm:$0xff] %v1095_v4  ;;  %1175 = vst [vmem:[#allocation2 + $0x8] sm:$0xff] %v1159_v34 }
 0x1cf   : > { %1119 = vst [vmem:[#allocation3 + $0x60] sm:$0xff] %v1103_v61  ;;  %1183 = vst [vmem:[#allocation2 + $0x78] sm:$0xff] %v1167_v36 }
 0x1d0   : > { %v1402_v24 = vld [vmem:[#allocation4 + $0x8] sm:$0xff]  ;;  %v1403_v12 = vld [vmem:[#allocation4] sm:$0xff]  ;;  %v1407_v31 = vld [vmem:[#allocation4 + $0x18] sm:$0xff] }
 0x1d1   : > { %v1404_v29 = vld [vmem:[#allocation4 + $0x48] sm:$0xff]  ;;  %v1405_v51 = vld [vmem:[#allocation4 + $0x60] sm:$0xff]  ;;  %v1408_v22 = vld [vmem:[#allocation4 + $0x10] sm:$0xff]  ;;  %v1419_v42 = vmin.f32 %v1403_v12, %v1407_v31 }
 0x1d2   : > { %v1406_v15 = vld [vmem:[#allocation4 + $0x68] sm:$0xff]  ;;  %v1409_v23 = vld [vmem:[#allocation4 + $0x38] sm:$0xff]  ;;  %v1410_v44 = vld [vmem:[#allocation4 + $0x40] sm:$0xff]  ;;  %v1420_v37 = vmin.f32 %v1404_v29, %v1408_v22 }
 0x1d3   : > { %v1418_v6 = vmin.f32 %v1402_v24, %v1406_v15  ;;  %v1411_v2 = vld [vmem:[#allocation4 + $0x28] sm:$0xff]  ;;  %v1412_v52 = vld [vmem:[#allocation4 + $0x70] sm:$0xff]  ;;  %v1413_v59 = vld [vmem:[#allocation4 + $0x20] sm:$0xff]  ;;  %v1421_v26 = vmin.f32 %v1405_v51, %v1409_v23 }
 0x1d4   : > { %v1414_v25 = vld [vmem:[#allocation4 + $0x58] sm:$0xff]  ;;  %v1415_v46 = vld [vmem:[#allocation4 + $0x30] sm:$0xff]  ;;  %v1423_v8 = vmin.f32 %v1419_v42, %v1411_v2  ;;  %v1424_v32 = vmin.f32 %v1420_v37, %v1412_v52  ;;  %v1447_v57 = vld [vmem:[#allocation5 + $0x48] sm:$0xff] }
 0x1d5   : > { %v1416_v10 = vld [vmem:[#allocation4 + $0x50] sm:$0xff]  ;;  %v1422_v60 = vmin.f32 %v1418_v6, %v1410_v44  ;;  %v1417_v28 = vld [vmem:[#allocation4 + $0x78] sm:$0xff]  ;;  %v1425_v39 = vmin.f32 %v1421_v26, %v1413_v59  ;;  %v1448_v43 = vld [vmem:[#allocation5 + $0x40] sm:$0xff] }
 0x1d6   : > { %v1445_v54 = vld [vmem:[#allocation5 + $0x18] sm:$0xff]  ;;  %v1427_v33 = vmin.f32 %v1423_v8, %v1415_v46  ;;  %v1449_v58 = vld [vmem:[#allocation5 + $0x28] sm:$0xff]  ;;  %v1428_v40 = vmin.f32 %v1424_v32, %v1416_v10  ;;  %v1450_v62 = vld [vmem:[#allocation5] sm:$0xff] }
 0x1d7   : > { %v1446_v20 = vld [vmem:[#allocation5 + $0x38] sm:$0xff]  ;;  %v1426_v35 = vmin.f32 %v1422_v60, %v1414_v25  ;;  %v1429_v16 = vmin.f32 %v1425_v39, %v1417_v28  ;;  %v1451_v13 = vld [vmem:[#allocation5 + $0x8] sm:$0xff]  ;;  %v1452_v38 = vld [vmem:[#allocation5 + $0x70] sm:$0xff]  ;;  %v1461_v49 = vmax.f32 %v1445_v54, %v1449_v58 }
 0x1d8   : > { %v1453_v14 = vld [vmem:[#allocation5 + $0x68] sm:$0xff]  ;;  %v1454_v45 = vld [vmem:[#allocation5 + $0x60] sm:$0xff]  ;;  %v1455_v7 = vld [vmem:[#allocation5 + $0x78] sm:$0xff]  ;;  %v1462_v9 = vmax.f32 %v1446_v20, %v1450_v62  ;;  %v1463_v0 = vmax.f32 %v1447_v57, %v1451_v13  ;;  %v1464_v1 = vmax.f32 %v1448_v43, %v1452_v38 }
 0x1d9   : > { %v1430_v3 = vmin.f32 %v1426_v35, %v1427_v33  ;;  %v1431_v30 = vmin.f32 %v1428_v40, %v1429_v16  ;;  %v1456_v5 = vld [vmem:[#allocation5 + $0x30] sm:$0xff]  ;;  %v1458_v17 = vld [vmem:[#allocation5 + $0x20] sm:$0xff]  ;;  %v1465_v41 = vmax.f32 %v1461_v49, %v1453_v14  ;;  %v1459_v56 = vld [vmem:[#allocation5 + $0x58] sm:$0xff] }
 0x1da   : > { %v1457_v47 = vld [vmem:[#allocation5 + $0x50] sm:$0xff]  ;;  %v1466_v27 = vmax.f32 %v1462_v9, %v1454_v45  ;;  %v1467_v48 = vmax.f32 %v1463_v0, %v1455_v7  ;;  %v1468_v53 = vmax.f32 %v1464_v1, %v1456_v5  ;;  %v1318_v18 = vld [vmem:[#allocation2] sm:$0xff]  ;;  %v1319_v4 = vld [vmem:[#allocation2 + $0x58] sm:$0xff] }
 0x1db   : > { %v1460_v55 = vld [vmem:[#allocation5 + $0x10] sm:$0xff]  ;;  %v1432_v11 = vmin.f32 %v1430_v3, %v1431_v30  ;;  %v1469_v21 = vmax.f32 %v1465_v41, %v1457_v47  ;;  %v1320_v36 = vld [vmem:[#allocation2 + $0x18] sm:$0xff]  ;;  %v1359_v22 = vld [vmem:[#allocation3 + $0x28] sm:$0xff] }
 0x1dc   : > { %v1317_v19 = vld [vmem:[#allocation2 + $0x30] sm:$0xff]  ;;  %v1470_v34 = vmax.f32 %v1466_v27, %v1458_v17  ;;  %v1471_v50 = vmax.f32 %v1467_v48, %v1459_v56  ;;  %v1472_v63 = vmax.f32 %v1468_v53, %v1460_v55  ;;  %v1360_v23 = vld [vmem:[#allocation3 + $0x68] sm:$0xff]  ;;  %v1362_v52 = vld [vmem:[#allocation3 + $0x40] sm:$0xff] }
 0x1dd   : > { %v1333_v61 = vadd.f32 %v1318_v18, %v1317_v19  ;;  %1433 = vmin.xlane.f32.xlu1 %v1432_v11  ;;  %v1321_v51 = vld [vmem:[#allocation2 + $0x50] sm:$0xff]  ;;  %v1322_v6 = vld [vmem:[#allocation2 + $0x68] sm:$0xff]  ;;  %v1375_v42 = vadd.f32 %v1360_v23, %v1359_v22  ;;  %v1325_v28 = vld [vmem:[#allocation2 + $0x40] sm:$0xff] }
 0x1de   : > { %v1473_v24 = vmax.f32 %v1469_v21, %v1470_v34  ;;  %v1474_v12 = vmax.f32 %v1471_v50, %v1472_v63  ;;  %v1361_v44 = vld [vmem:[#allocation3 + $0x10] sm:$0xff]  ;;  %v1323_v59 = vld [vmem:[#allocation2 + $0x8] sm:$0xff]  ;;  %v1326_v20 = vld [vmem:[#allocation2 + $0x20] sm:$0xff] }
 0x1df   : > { %v1334_v29 = vadd.f32 %v1333_v61, %v1319_v4  ;;  %v1376_v37 = vadd.f32 %v1375_v42, %v1361_v44  ;;  %v1363_v25 = vld [vmem:[#allocation3 + $0x48] sm:$0xff]  ;;  %v1364_v8 = vld [vmem:[#allocation3 + $0x30] sm:$0xff]  ;;  %v1366_v57 = vld [vmem:[#allocation3 + $0x38] sm:$0xff] }
 0x1e0   : > { %v1475_v15 = vmax.f32 %v1473_v24, %v1474_v12  ;;  %v1324_v46 = vld [vmem:[#allocation2 + $0x48] sm:$0xff]  ;;  %v1365_v54 = vld [vmem:[#allocation3 + $0x70] sm:$0xff]  ;;  %v1367_v16 = vld [vmem:[#allocation3 + $0x20] sm:$0xff] }
 0x1e1   : > { %v1335_v31 = vadd.f32 %v1334_v29, %v1320_v36  ;;  %v1377_v10 = vadd.f32 %v1376_v37, %v1362_v52  ;;  %v1327_v43 = vld [vmem:[#allocation2 + $0x10] sm:$0xff]  ;;  %v1328_v62 = vld [vmem:[#allocation2 + $0x38] sm:$0xff]  ;;  %v1329_v3 = vld [vmem:[#allocation2 + $0x60] sm:$0xff] }
 0x1e2   : > { %1476 = vmax.xlane.f32.xlu1 %v1475_v15  ;;  %v1368_v49 = vld [vmem:[#allocation3 + $0x78] sm:$0xff]  ;;  %v1330_v9 = vld [vmem:[#allocation2 + $0x70] sm:$0xff]  ;;  %v1371_v41 = vld [vmem:[#allocation3] sm:$0xff] }
 0x1e3   : > { %v1336_v2 = vadd.f32 %v1335_v31, %v1321_v51  ;;  %v1378_v32 = vadd.f32 %v1377_v10, %v1363_v25  ;;  %v1369_v7 = vld [vmem:[#allocation3 + $0x18] sm:$0xff]  ;;  %v1332_v56 = vld [vmem:[#allocation2 + $0x28] sm:$0xff]  ;;  %v1373_v11 = vld [vmem:[#allocation3 + $0x60] sm:$0xff] }
 0x1e4   : > { %v1370_v30 = vld [vmem:[#allocation3 + $0x58] sm:$0xff]  ;;  %v1372_v48 = vld [vmem:[#allocation3 + $0x8] sm:$0xff]  ;;  %v1374_v18 = vld [vmem:[#allocation3 + $0x50] sm:$0xff] }
 0x1e5   : > { %v1337_v26 = vadd.f32 %v1336_v2, %v1322_v6  ;;  %v1379_v35 = vadd.f32 %v1378_v32, %v1364_v8  ;;  %v1331_v5 = vld [vmem:[#allocation2 + $0x78] sm:$0xff] }
 0x1e7   : > { %v1338_v60 = vadd.f32 %v1337_v26, %v1323_v59  ;;  %v1380_v58 = vadd.f32 %v1379_v35, %v1365_v54 }
 0x1e9   : > { %v1339_v39 = vadd.f32 %v1338_v60, %v1324_v46  ;;  %v1381_v13 = vadd.f32 %v1380_v58, %v1366_v57 }
 0x1eb   : > { %v1340_v33 = vadd.f32 %v1339_v39, %v1325_v28  ;;  %v1382_v14 = vadd.f32 %v1381_v13, %v1367_v16 }
 0x1ed   : > { %v1341_v40 = vadd.f32 %v1340_v33, %v1326_v20  ;;  %v1383_v0 = vadd.f32 %v1382_v14, %v1368_v49 }
 0x1ef   : > { %v1342_v38 = vadd.f32 %v1341_v40, %v1327_v43  ;;  %v1384_v47 = vadd.f32 %v1383_v0, %v1369_v7 }
 0x1f1   : > { %v1343_v45 = vadd.f32 %v1342_v38, %v1328_v62  ;;  %v1385_v55 = vadd.f32 %v1384_v47, %v1370_v30 }
 0x1f3   : > { %v1344_v1 = vadd.f32 %v1343_v45, %v1329_v3  ;;  %v1386_v53 = vadd.f32 %v1385_v55, %v1371_v41 }
 0x1f5   : > { %v1345_v17 = vadd.f32 %v1344_v1, %v1330_v9  ;;  %v1387_v21 = vadd.f32 %v1386_v53, %v1372_v48 }
 0x1f7   : > { %v1346_v27 = vadd.f32 %v1345_v17, %v1331_v5  ;;  %v1388_v4 = vadd.f32 %v1387_v21, %v1373_v11 }
 0x1f9   : > { %v1347_v19 = vadd.f32 %v1346_v27, %v1332_v56  ;;  %v1389_v34 = vadd.f32 %v1388_v4, %v1374_v18 }
 0x1fb   : > { %1348 = vadd.xlane.f32.xlu0 %v1347_v19 }
 0x1ff   : > { %1390 = vadd.xlane.f32.xlu0 %v1389_v34 }
 0x266   : > { %v1434_v50 = vpop.xlane.xlu1 %1433 }
 0x267   : > { %v1435_v61 = vrot.slane %v1434_v50, 4 }
 0x269   : > { %v1436_v12 = vmin.f32 %v1434_v50, %v1435_v61 }
 0x26b   : > { %v1477_v63 = vpop.xlane.xlu1 %1476  ;;  %v1437_v31 = vrot.slane %v1436_v12, 2 }
 0x26c   : > { %v1478_v36 = vrot.slane %v1477_v63, 4 }
 0x26d   : > { %v1438_v59 = vmin.f32 %v1436_v12, %v1437_v31 }
 0x26e   : > { %v1479_v51 = vmax.f32 %v1477_v63, %v1478_v36 }
 0x26f   : > { %v1439_v10 = vrot.slane %v1438_v59, 1 }
 0x270   : > { %v1480_v44 = vrot.slane %v1479_v51, 2 }
 0x271   : > { %v1440_v32 = vmin.f32 %v1438_v59, %v1439_v10 }
 0x272   : > { %v1481_v37 = vmax.f32 %v1479_v51, %v1480_v44 }
 0x274   : > { %v1482_v8 = vrot.slane %v1481_v37, 1 }
 0x276   : > { %v1483_v39 = vmax.f32 %v1481_v37, %v1482_v8 }
 0x284   : > { %v1349_v24 = vpop.xlane.xlu0 %1348 }
 0x285   : > { %v1350_v29 = vrot.slane %v1349_v24, 4 }
 0x287   : > { %v1351_v15 = vadd.f32 %v1350_v29, %v1349_v24 }
 0x288   : > { %v1391_v23 = vpop.xlane.xlu0 %1390 }
 0x289   : > { %v1352_v22 = vrot.slane %v1351_v15, 2  ;;  %v1392_v6 = vrot.slane %v1391_v23, 4 }
 0x28b   : > { %v1353_v42 = vadd.f32 %v1352_v22, %v1351_v15  ;;  %v1393_v2 = vadd.f32 %v1392_v6, %v1391_v23 }
 0x28d   : > { %v1354_v52 = vrot.slane %v1353_v42, 1  ;;  %v1394_v26 = vrot.slane %v1393_v2, 2 }
 0x28f   : > { %v1355_v25 = vadd.f32 %v1354_v52, %v1353_v42  ;;  %v1395_v46 = vadd.f32 %v1394_v26, %v1393_v2 }
 0x291   : > { %1789 = vpush %v1355_v25  ;;  %v1396_v60 = vrot.slane %v1395_v46, 1 }
 0x293   : > { %v1397_v28 = vadd.f32 %v1396_v60, %v1395_v46 }
 0x295   : > { %1791 = vpush %v1397_v28 }
 0x296   : > { %1793 = vpush %v1440_v32 }
 0x297   : > { %1795 = vpush %v1483_v39 }
 0x2c2   : > { %s1790_s20 = spop %1789 }
 0x2c3   : > { %v1357_v54 = vstv %s1790_s20 }
 0x2c4   : > { %1358 = vst [vmem:[%s2248_s27] sm:$0xff] %v1357_v54 }
 0x2c6   : > { %s1792_s0 = spop %1791 }
 0x2c7   : > { %v1399_v20 = vstv %s1792_s0  ;;  %s1794_s12 = spop %1793 }
 0x2c8   : > { %1660 = vst [vmem:[%s2248_s27 + $0x8] sm:$0xff] %v1399_v20  ;;  %v1442_v35 = vstv %s1794_s12  ;;  %s1796_s1 = spop %1795 }
 0x2c9   : > { %1661 = vst [vmem:[%s2248_s27 + $0x10] sm:$0xff] %v1442_v35  ;;  %v1485_v33 = vstv %s1796_s1 }
 0x2ca   : > { %1662 = vst [vmem:[%s2248_s27 + $0x18] sm:$0xff] %v1485_v33 }
 0x2cb PF: > { %s1668_s15 = sshll.u32 %s2059_s21, 9  ;;  %s1502_s25 = sshll.u32 %s2248_s27, 4  ;;  %s3478_s25 = int_to_ptr.vmem [resolvable:$true] %s1502_s25 }
 0x2cc   : > { %s3475_s13 = scalar_lea.hbm %s3539_s8, %s1668_s15  ;;  %s3834_s29 = sand.u32 1, %s2047_s19  }
 0x2cd   : > { %s3482_s11 = scalar_lea.sflag [#allocation11], %s3834_s29  ;;  %s1973_s10 = scalar_lea.vmem %s3478_s25, 512 }
 0x2ce   : > { %p1974_p6 = scmp.ne.s32.totalorder %s3478_s25, %s1973_s10  ;;  %s2081_s21 = smov [#allocation13]  }
 0x2cf   : > { %s1977_s7 = sshll.u32 %s2081_s21, 4  ;;  %s1978_s7 = int_to_ptr.vmem [resolvable:$false] %s1977_s7 }
 0x2d0   : > { %p1975_p7 = pnand %p1974_p6, %p2188_p4  ;;  %s1979_s28 = scalar_lea.vmem %s1978_s7, 1024 }
 0x2d1   : > { %p1980_p9 = scmp.lt.s32.totalorder %s3478_s25, %s1978_s7  ;;  %p1981_p10 = scmp.lt.s32.totalorder %s1979_s28, %s1973_s10 }
 0x2d2   : > { %p1976_p8 = pneg %p1975_p7 }
 0x2d3   : > { %p1982_p11 = por %p1981_p10, %p1980_p9 }
 0x2d5   : > { %p1983_p12 = pnand %p1982_p11, %p1976_p8 }
 0x2d7   : > { %1986 = shalt.err (!%p1983_p12)
}
 0x2d8   : > { %s1987_s27 = scalar_lea.hbm %s3475_s13, 512  ;;  %s1991_s0 = scalar_lea.hbm %s3539_s8, 1024 }
 0x2d9   : > { %p1988_p13 = scmp.ne.s32.totalorder %s3475_s13, %s1987_s27  ;;  %p1992_p2 = scmp.lt.s32.totalorder %s3475_s13, %s3539_s8 }
 0x2da   : > { %p1993_p3 = scmp.lt.s32.totalorder %s1991_s0, %s1987_s27 }
 0x2db   : > { %p1989_p0 = pnand %p1988_p13, %p2188_p4 }
 0x2dc   : > { %p1994_p5 = por %p1993_p3, %p1992_p2 }
 0x2dd   : > { %p1990_p1 = pneg %p1989_p0 }
 0x2df   : > { %p1995_p6 = pnand %p1994_p5, %p1990_p1 }
 0x2e1   : > { %1998 = shalt.err (!%p1995_p6)
}
 0x2e2   : > { %s2082_s15 = smov 128   ;;  %s2083_s17 = smov 8  }
 0x2e3   : > { %1801 = dma.vmem_to_hbm [thread:$0]  (%p2188_p4), %s3478_s25, 512, %s3475_s13, %s3482_s11, %s2082_s15, %s2082_s15, %s2083_s17  }
 0x2e4 PF: > { %p1813_p7 = scmp.ge.s32.totalorder %s2071_s24, 2  ;;  %s1517_s16 = sand.u32 1, %s2043_s18  }
 0x2e5   : > { %p3835_p8 = scmp.ne.s32.totalorder %s3604_s9, 0  ;;  %s1518_s29 = scalar_lea.sflag [#allocation11], %s1517_s16 }
 0x2e7   : > { %p1808_p9 = pnand %p1813_p7, %p3835_p8 }
 0x2e9   : > { %p1809_p10 = pneg %p1808_p9 }
 0x2eb   : > { %2038 = dma.done.wait (%p1809_p10), %s1518_s29, 512  }
 0x2ec   : > { %2040 = vsyncadd (%p1809_p10), %s1518_s29, 4294966784  ;;  %s36_s24 = sadd.s32 1, %s2071_s24   ;;  %s3836_s30 = sld [smem:[#allocation17_spill]] }
 0x2ed   : > { %p33_p11 = scmp.ge.s32.totalorder %s36_s24, 6   ;;  %s3837_s13 = sld [smem:[#allocation18_spill]] }
 0x2ee   : > { %s3838_s18 = smov %s2047_s19  ;;  %s3839_s19 = smov %s2051_s2 }
 0x2ef   : > { %s3840_s2 = smov %s2218_s14  ;;  %s3841_s20 = smov %s2063_s22 }
 0x2f0   : > { %s3842_s21 = smov %s2067_s23  ;;  %35 = sbr.rel (!%p33_p11) target bundleno = 42 (0x2a), region = 96 }
 0x2f2   : > { %s3843_s22 = smov %s3836_s30 }
 0x2f3   : > { %s3844_s23 = smov %s3837_s13 }
 0x2f5   :  { %1523 = vsyncpa [#allocation11], 1 }
 0x2f6   :  { %1525 = vsyncpa [#allocation11 + $0x1], 1 }
 0x2f7   :  { %1526 = vsyncpa [#allocation12], 1 }
 0x2f8   :  { %1528 = vsyncpa [#allocation12 + $0x1], 1 }

</bundles_post_ra>
